<compile_context>
chip_gen: v7x
topology: tpu7x:2x2x1
jax: 0.10.0
libtpu: 0.0.40
codegen_flags: <defaults>
</compile_context>

<pallas_src>
import jax
import jax.numpy as jnp
import numpy as np
from jax.experimental import pallas as pl
from jax.experimental.pallas import tpu as pltpu


def _disc_kernel(xi_ref, xoh_ref, w1i_ref, w1e_ref, b1_ref,
                 w2_ref, b2_ref, w3_ref, b3_ref, o_ref):
    # Linear(2P -> H): image half + folded label-embedding half.
    # bf16 MXU inputs, f32 accumulation.
    h1 = (jnp.dot(xi_ref[...], w1i_ref[...], preferred_element_type=jnp.float32)
          + jnp.dot(xoh_ref[...], w1e_ref[...], preferred_element_type=jnp.float32)
          + b1_ref[...])
    h1 = jnp.maximum(h1, 0.2 * h1)                      # LeakyReLU(0.2)

    # Linear(H -> H) + Dropout(0.4) [eval-mode identity] + LeakyReLU(0.2).
    h2 = jnp.dot(h1.astype(jnp.bfloat16), w2_ref[...],
                 preferred_element_type=jnp.float32) + b2_ref[...]
    h2 = jnp.maximum(h2, 0.2 * h2)

    # Linear(H -> 1) + Sigmoid, emitted lane-dense as a (1, TB) row:
    # (1, H) contracted with (TB, H) over H -> (1, TB)   (no 1-lane column).
    logit = jax.lax.dot_general(
        w3_ref[...], h2.astype(jnp.bfloat16),
        dimension_numbers=(((1,), (1,)), ((), ())),
        preferred_element_type=jnp.float32) + b3_ref[0, 0]
    logit = jnp.clip(logit, -30.0, 30.0)                # keep exp() finite
    sig = pl.reciprocal(1.0 + jnp.exp(-logit), approx=True)
    o_ref[...] = sig.reshape(o_ref.shape)


def _round_up(n, m):
    return ((n + m - 1) // m) * m


def _pick_batch_tile(b16):
    """Largest tile in {512,...,16} that still gives >= 2 grid steps."""
    if b16 < 32:
        return b16
    for cand in (512, 256, 128, 64, 32, 16):
        if cand <= b16 // 2:
            return cand
    return 16


def discriminator_forward(img, labels, params):
    """img: (B, C, H, W) f32, labels: (B,) int32 -> (B, 1) f32 in [0, 1]."""
    B = img.shape[0]
    P = int(np.prod(img.shape[1:]))
    H = params["w2"].shape[0]
    NC = params["emb"].shape[0]
    NCp = _round_up(NC, 128)        # lane-pad the one-hot / folded-table K dim

    # --- wrapper glue: no (B, 2P) concat, no (B, P) embedding gather --------
    img_flat = img.reshape(B, P)
    # emb[labels] @ w1[P:]  ==  one_hot(labels) @ (emb @ w1[P:])   (exact)
    emb_w1 = jnp.pad(params["emb"] @ params["w1"][P:], ((0, NCp - NC), (0, 0)))
    onehot = jax.nn.one_hot(labels, NCp, dtype=jnp.bfloat16)        # (B, NCp)

    # --- batch tiling: pad to 16 (bf16 sublanes), tiles of up to 512 rows ---
    B16 = _round_up(max(B, 1), 16)
    TB = _pick_batch_tile(B16)
    B_pad = _round_up(B16, TB)
    if B_pad != B:
        img_flat = jnp.pad(img_flat, ((0, B_pad - B), (0, 0)))
        onehot = jnp.pad(onehot, ((0, B_pad - B), (0, 0)))
    n_tiles = B_pad // TB

    # bf16 MXU inputs; f32 accumulation / biases / activations in-kernel.
    xi = img_flat.astype(jnp.bfloat16)                    # (B_pad, P)
    w1i = params["w1"][:P].astype(jnp.bfloat16)           # (P, H)
    w1e = emb_w1.astype(jnp.bfloat16)                     # (NCp, H)
    w2 = params["w2"].astype(jnp.bfloat16)                # (H, H)
    b1 = params["b1"]                                     # (1, H) f32
    b2 = params["b2"]                                     # (1, H) f32
    w3 = params["w3"].reshape(1, H).astype(jnp.bfloat16)  # (1, H)
    b3 = params["b3"].reshape(1, 1)                       # (1, 1) f32 -> SMEM

    cost = pl.CostEstimate(
        flops=2 * B_pad * (P * H + NCp * H + H * H + H),
        transcendentals=B_pad,
        bytes_accessed=(2 * B_pad * (P + NCp)                 # bf16 activations
                        + 2 * (P * H + NCp * H + H * H + H)   # bf16 weights
                        + 4 * (2 * H + 1)                     # f32 biases
                        + 4 * B_pad),                         # f32 output
    )

    def run(single_buffer_weights):
        def act_spec(cols):
            # TODO(synk): on v5e, add pipeline_mode=pl.Buffered(3) here if
            # profiling shows exposed activation DMA.
            return pl.BlockSpec((TB, cols), lambda i: (i, 0))

        def res_spec(shape):
            # Constant block index -> a single resident VMEM buffer suffices.
            if single_buffer_weights:
                return pl.BlockSpec(shape, lambda i: (0, 0),
                                    pipeline_mode=pl.Buffered(1))
            return pl.BlockSpec(shape, lambda i: (0, 0))

        out = pl.pallas_call(
            _disc_kernel,
            out_shape=jax.ShapeDtypeStruct((n_tiles, 1, TB), jnp.float32),
            grid=(n_tiles,),
            in_specs=[
                act_spec(P),                 # image half of x
                act_spec(NCp),               # one-hot labels
                res_spec((P, H)),            # w1 (image half)
                res_spec((NCp, H)),          # folded emb @ w1 (embedding half)
                res_spec((1, H)),            # b1
                res_spec((H, H)),            # w2
                res_spec((1, H)),            # b2
                res_spec((1, H)),            # w3 row
                pl.BlockSpec(memory_space=pltpu.MemorySpace.SMEM),  # b3 scalar
            ],
            out_specs=pl.BlockSpec((1, 1, TB), lambda i: (i, 0, 0)),
            compiler_params=pltpu.CompilerParams(
                dimension_semantics=("parallel",)),
            cost_estimate=cost,
        )(xi, onehot, w1i, w1e, b1, w2, b2, w3, b3)
        return jax.block_until_ready(out)

    try:
        out = run(single_buffer_weights=True)
    except Exception:
        # Fallback for jax builds without BlockSpec.pipeline_mode support:
        # identical semantics, default (double-buffered) resident weights.
        out = run(single_buffer_weights=False)

    return out.reshape(-1)[:B].reshape(B, 1)


def init_params(key, num_classes, img_shape, hidden=512):
    P = int(np.prod(img_shape))
    ks = jax.random.split(key, 7)
    scale = 0.02
    return {
        "emb": scale * jax.random.normal(ks[0], (num_classes, P), jnp.float32),
        "w1": scale * jax.random.normal(ks[1], (2 * P, hidden), jnp.float32),
        "b1": scale * jax.random.normal(ks[2], (1, hidden), jnp.float32),
        "w2": scale * jax.random.normal(ks[3], (hidden, hidden), jnp.float32),
        "b2": scale * jax.random.normal(ks[4], (1, hidden), jnp.float32),
        "w3": scale * jax.random.normal(ks[5], (hidden, 1), jnp.float32),
        "b3": scale * jax.random.normal(ks[6], (1, 1), jnp.float32),
    }


if __name__ == "__main__":
    key = jax.random.PRNGKey(0)
    k_img, k_lab, k_par = jax.random.split(key, 3)

    num_classes = 10
    img_shape = (1, 16, 16)          # prod = 256
    B = 2

    img = jax.random.normal(k_img, (B,) + img_shape, jnp.float32)
    labels = jax.random.randint(k_lab, (B,), 0, num_classes, jnp.int32)
    params = init_params(k_par, num_classes, img_shape)

    out = discriminator_forward(img, labels, params)
    out = jax.block_until_ready(out)

    # Pure-JAX f32 reference (kernel uses bf16 MXU inputs -> loose tolerance).
    P = int(np.prod(img_shape))
    x = jnp.concatenate([img.reshape(B, P), params["emb"][labels]], axis=1)
    h1p = x @ params["w1"] + params["b1"]
    h1 = jnp.where(h1p > 0, h1p, 0.2 * h1p)
    h2p = h1 @ params["w2"] + params["b2"]
    h2 = jnp.where(h2p > 0, h2p, 0.2 * h2p)
    ref = jax.nn.sigmoid(h2 @ params["w3"] + params["b3"])
    np.testing.assert_allclose(np.asarray(out), np.asarray(ref),
                               rtol=2e-2, atol=2e-2)

    assert out.shape == (B, 1)
    print("KERNEL_OK")
</pallas_src>

<mosaic_0001>
module attributes {stable_mosaic.version = 11 : i64} {
  func.func @_disc_kernel(%arg0: i32, %arg1: memref<16x256xbf16, #tpu.memory_space<vmem>>, %arg2: memref<16x128xbf16, #tpu.memory_space<vmem>>, %arg3: memref<256x512xbf16, #tpu.memory_space<vmem>>, %arg4: memref<128x512xbf16, #tpu.memory_space<vmem>>, %arg5: memref<1x512xf32, #tpu.memory_space<vmem>>, %arg6: memref<512x512xbf16, #tpu.memory_space<vmem>>, %arg7: memref<1x512xf32, #tpu.memory_space<vmem>>, %arg8: memref<1x512xbf16, #tpu.memory_space<vmem>>, %arg9: memref<1x1xf32, #tpu.memory_space<smem>>, %arg10: memref<1x1x16xf32, #tpu.memory_space<vmem>>) attributes {dimension_semantics = [#tpu.dimension_semantics<parallel>], iteration_bounds = array<i64: 1>, scalar_prefetch = 0 : i64, scratch_operands = 0 : i64, tpu.core_type = #tpu.core_type<tc>, window_params = [{transform_indices = @transform_0, window_bounds = array<i64: 16, 256>}, {transform_indices = @transform_1, window_bounds = array<i64: 16, 128>}, {pipeline_mode = #tpu.pipeline_mode<synchronous>, transform_indices = @transform_2, window_bounds = array<i64: 256, 512>}, {pipeline_mode = #tpu.pipeline_mode<synchronous>, transform_indices = @transform_3, window_bounds = array<i64: 128, 512>}, {pipeline_mode = #tpu.pipeline_mode<synchronous>, transform_indices = @transform_4, window_bounds = array<i64: 1, 512>}, {pipeline_mode = #tpu.pipeline_mode<synchronous>, transform_indices = @transform_5, window_bounds = array<i64: 512, 512>}, {pipeline_mode = #tpu.pipeline_mode<synchronous>, transform_indices = @transform_6, window_bounds = array<i64: 1, 512>}, {pipeline_mode = #tpu.pipeline_mode<synchronous>, transform_indices = @transform_7, window_bounds = array<i64: 1, 512>}, {transform_indices = @transform_8, window_bounds = array<i64: 1, 1>}, {transform_indices = @transform_9, window_bounds = array<i64: 1, 1, 16>}]} {
    %c0 = arith.constant 0 : index
    %c0_0 = arith.constant 0 : index
    %0 = vector.load %arg1[%c0, %c0_0] : memref<16x256xbf16, #tpu.memory_space<vmem>>, vector<16x256xbf16>
    %c0_1 = arith.constant 0 : index
    %c0_2 = arith.constant 0 : index
    %1 = vector.load %arg3[%c0_1, %c0_2] : memref<256x512xbf16, #tpu.memory_space<vmem>>, vector<256x512xbf16>
    %cst = arith.constant dense<0.000000e+00> : vector<16x512xf32>
    %2 = tpu.matmul %0, %1, %cst {dimension_numbers = #tpu.dot_dimension_numbers<[1], [0], [0], [1], [0, 0, 1, 1], [], []>} : vector<16x256xbf16>, vector<256x512xbf16>, vector<16x512xf32> -> vector<16x512xf32>
    %c0_3 = arith.constant 0 : index
    %c0_4 = arith.constant 0 : index
    %3 = vector.load %arg2[%c0_3, %c0_4] : memref<16x128xbf16, #tpu.memory_space<vmem>>, vector<16x128xbf16>
    %c0_5 = arith.constant 0 : index
    %c0_6 = arith.constant 0 : index
    %4 = vector.load %arg4[%c0_5, %c0_6] : memref<128x512xbf16, #tpu.memory_space<vmem>>, vector<128x512xbf16>
    %cst_7 = arith.constant dense<0.000000e+00> : vector<16x512xf32>
    %5 = tpu.matmul %3, %4, %cst_7 {dimension_numbers = #tpu.dot_dimension_numbers<[1], [0], [0], [1], [0, 0, 1, 1], [], []>} : vector<16x128xbf16>, vector<128x512xbf16>, vector<16x512xf32> -> vector<16x512xf32>
    %6 = arith.addf %2, %5 : vector<16x512xf32>
    %c0_8 = arith.constant 0 : index
    %c0_9 = arith.constant 0 : index
    %7 = vector.load %arg5[%c0_8, %c0_9] : memref<1x512xf32, #tpu.memory_space<vmem>>, vector<1x512xf32>
    %8 = vector.broadcast %7 : vector<1x512xf32> to vector<16x512xf32>
    %9 = arith.addf %6, %8 : vector<16x512xf32>
    %cst_10 = arith.constant 2.000000e-01 : f32
    %10 = vector.broadcast %cst_10 : f32 to vector<16x512xf32>
    %11 = arith.mulf %10, %9 : vector<16x512xf32>
    %12 = arith.maximumf %9, %11 : vector<16x512xf32>
    %13 = arith.truncf %12 : vector<16x512xf32> to vector<16x512xbf16>
    %c0_11 = arith.constant 0 : index
    %c0_12 = arith.constant 0 : index
    %14 = vector.load %arg6[%c0_11, %c0_12] : memref<512x512xbf16, #tpu.memory_space<vmem>>, vector<512x512xbf16>
    %cst_13 = arith.constant dense<0.000000e+00> : vector<16x512xf32>
    %15 = tpu.matmul %13, %14, %cst_13 {dimension_numbers = #tpu.dot_dimension_numbers<[1], [0], [0], [1], [0, 0, 1, 1], [], []>} : vector<16x512xbf16>, vector<512x512xbf16>, vector<16x512xf32> -> vector<16x512xf32>
    %c0_14 = arith.constant 0 : index
    %c0_15 = arith.constant 0 : index
    %16 = vector.load %arg7[%c0_14, %c0_15] : memref<1x512xf32, #tpu.memory_space<vmem>>, vector<1x512xf32>
    %17 = vector.broadcast %16 : vector<1x512xf32> to vector<16x512xf32>
    %18 = arith.addf %15, %17 : vector<16x512xf32>
    %cst_16 = arith.constant 2.000000e-01 : f32
    %19 = vector.broadcast %cst_16 : f32 to vector<16x512xf32>
    %20 = arith.mulf %19, %18 : vector<16x512xf32>
    %21 = arith.maximumf %18, %20 : vector<16x512xf32>
    %c0_17 = arith.constant 0 : index
    %c0_18 = arith.constant 0 : index
    %22 = vector.load %arg8[%c0_17, %c0_18] : memref<1x512xbf16, #tpu.memory_space<vmem>>, vector<1x512xbf16>
    %23 = arith.truncf %21 : vector<16x512xf32> to vector<16x512xbf16>
    %cst_19 = arith.constant dense<0.000000e+00> : vector<1x16xf32>
    %24 = tpu.matmul %22, %23, %cst_19 {dimension_numbers = #tpu.dot_dimension_numbers<[1], [1], [0], [0], [0, 0, 1, 0], [], []>} : vector<1x512xbf16>, vector<16x512xbf16>, vector<1x16xf32> -> vector<1x16xf32>
    %c0_20 = arith.constant 0 : index
    %c0_21 = arith.constant 0 : index
    %25 = memref.load %arg9[%c0_20, %c0_21] : memref<1x1xf32, #tpu.memory_space<smem>>
    %26 = vector.broadcast %25 : f32 to vector<1x16xf32>
    %27 = arith.addf %24, %26 : vector<1x16xf32>
    %cst_22 = arith.constant -3.000000e+01 : f32
    %cst_23 = arith.constant 3.000000e+01 : f32
    %28 = vector.broadcast %cst_22 : f32 to vector<1x16xf32>
    %29 = arith.maximumf %28, %27 : vector<1x16xf32>
    %30 = vector.broadcast %cst_23 : f32 to vector<1x16xf32>
    %31 = arith.minimumf %30, %29 : vector<1x16xf32>
    %cst_24 = arith.constant 0.000000e+00 : f32
    %32 = vector.broadcast %cst_24 : f32 to vector<1x16xf32>
    %33 = arith.subf %32, %31 : vector<1x16xf32>
    %34 = math.exp %33 : vector<1x16xf32>
    %cst_25 = arith.constant 1.000000e+00 : f32
    %35 = vector.broadcast %cst_25 : f32 to vector<1x16xf32>
    %36 = arith.addf %35, %34 : vector<1x16xf32>
    %37 = tpu.reciprocal %36 {approx = true} : vector<1x16xf32> -> vector<1x16xf32>
    %38 = vector.shape_cast %37 : vector<1x16xf32> to vector<1x1x16xf32>
    %c0_26 = arith.constant 0 : index
    %c0_27 = arith.constant 0 : index
    %c0_28 = arith.constant 0 : index
    %39 = vector.load %arg10[%c0_26, %c0_27, %c0_28] : memref<1x1x16xf32, #tpu.memory_space<vmem>>, vector<1x1x16xf32>
    tpu.vector_store %arg10[%c0_26, %c0_27, %c0_28], %38 {strides = array<i32>} : memref<1x1x16xf32, #tpu.memory_space<vmem>>, vector<1x1x16xf32>,
    return
  }
  func.func @transform_0(%arg0: i32) -> (i32, i32) {
    %c0_i32 = arith.constant 0 : i32
    %c0_i32_0 = arith.constant 0 : i32
    return %arg0, %c0_i32 : i32, i32
  }
  func.func @transform_1(%arg0: i32) -> (i32, i32) {
    %c0_i32 = arith.constant 0 : i32
    %c0_i32_0 = arith.constant 0 : i32
    return %arg0, %c0_i32 : i32, i32
  }
  func.func @transform_2(%arg0: i32) -> (i32, i32) {
    %c0_i32 = arith.constant 0 : i32
    %c0_i32_0 = arith.constant 0 : i32
    %c0_i32_1 = arith.constant 0 : i32
    return %c0_i32, %c0_i32_0 : i32, i32
  }
  func.func @transform_3(%arg0: i32) -> (i32, i32) {
    %c0_i32 = arith.constant 0 : i32
    %c0_i32_0 = arith.constant 0 : i32
    %c0_i32_1 = arith.constant 0 : i32
    return %c0_i32, %c0_i32_0 : i32, i32
  }
  func.func @transform_4(%arg0: i32) -> (i32, i32) {
    %c0_i32 = arith.constant 0 : i32
    %c0_i32_0 = arith.constant 0 : i32
    %c0_i32_1 = arith.constant 0 : i32
    return %c0_i32, %c0_i32_0 : i32, i32
  }
  func.func @transform_5(%arg0: i32) -> (i32, i32) {
    %c0_i32 = arith.constant 0 : i32
    %c0_i32_0 = arith.constant 0 : i32
    %c0_i32_1 = arith.constant 0 : i32
    return %c0_i32, %c0_i32_0 : i32, i32
  }
  func.func @transform_6(%arg0: i32) -> (i32, i32) {
    %c0_i32 = arith.constant 0 : i32
    %c0_i32_0 = arith.constant 0 : i32
    %c0_i32_1 = arith.constant 0 : i32
    return %c0_i32, %c0_i32_0 : i32, i32
  }
  func.func @transform_7(%arg0: i32) -> (i32, i32) {
    %c0_i32 = arith.constant 0 : i32
    %c0_i32_0 = arith.constant 0 : i32
    %c0_i32_1 = arith.constant 0 : i32
    return %c0_i32, %c0_i32_0 : i32, i32
  }
  func.func @transform_8(%arg0: i32) -> (i32, i32) {
    %c0_i32 = arith.constant 0 : i32
    %c0_i32_0 = arith.constant 0 : i32
    %c0_i32_1 = arith.constant 0 : i32
    return %c0_i32, %c0_i32_0 : i32, i32
  }
  func.func @transform_9(%arg0: i32) -> (i32, i32, i32) {
    %c0_i32 = arith.constant 0 : i32
    %c0_i32_0 = arith.constant 0 : i32
    %c0_i32_1 = arith.constant 0 : i32
    return %arg0, %c0_i32, %c0_i32_0 : i32, i32, i32
  }
}

module attributes {stable_mosaic.version = 11 : i64} {
  func.func @_disc_kernel(%arg0: i32, %arg1: memref<16x256xbf16, #tpu.memory_space<vmem>>, %arg2: memref<16x128xbf16, #tpu.memory_space<vmem>>, %arg3: memref<256x512xbf16, #tpu.memory_space<vmem>>, %arg4: memref<128x512xbf16, #tpu.memory_space<vmem>>, %arg5: memref<1x512xf32, #tpu.memory_space<vmem>>, %arg6: memref<512x512xbf16, #tpu.memory_space<vmem>>, %arg7: memref<1x512xf32, #tpu.memory_space<vmem>>, %arg8: memref<1x512xbf16, #tpu.memory_space<vmem>>, %arg9: memref<1x1xf32, #tpu.memory_space<smem>>, %arg10: memref<1x1x16xf32, #tpu.memory_space<vmem>>) attributes {dimension_semantics = [#tpu.dimension_semantics<parallel>], iteration_bounds = array<i64: 1>, scalar_prefetch = 0 : i64, scratch_operands = 0 : i64, tpu.core_type = #tpu.core_type<tc>, window_params = [{transform_indices = @transform_0, window_bounds = array<i64: 16, 256>}, {transform_indices = @transform_1, window_bounds = array<i64: 16, 128>}, {pipeline_mode = #tpu.pipeline_mode<synchronous>, transform_indices = @transform_2, window_bounds = array<i64: 256, 512>}, {pipeline_mode = #tpu.pipeline_mode<synchronous>, transform_indices = @transform_3, window_bounds = array<i64: 128, 512>}, {pipeline_mode = #tpu.pipeline_mode<synchronous>, transform_indices = @transform_4, window_bounds = array<i64: 1, 512>}, {pipeline_mode = #tpu.pipeline_mode<synchronous>, transform_indices = @transform_5, window_bounds = array<i64: 512, 512>}, {pipeline_mode = #tpu.pipeline_mode<synchronous>, transform_indices = @transform_6, window_bounds = array<i64: 1, 512>}, {pipeline_mode = #tpu.pipeline_mode<synchronous>, transform_indices = @transform_7, window_bounds = array<i64: 1, 512>}, {transform_indices = @transform_8, window_bounds = array<i64: 1, 1>}, {transform_indices = @transform_9, window_bounds = array<i64: 1, 1, 16>}]} {
    %c0 = arith.constant 0 : index
    %c0_0 = arith.constant 0 : index
    %0 = vector.load %arg1[%c0, %c0_0] : memref<16x256xbf16, #tpu.memory_space<vmem>>, vector<16x256xbf16>
    %c0_1 = arith.constant 0 : index
    %c0_2 = arith.constant 0 : index
    %1 = vector.load %arg3[%c0_1, %c0_2] : memref<256x512xbf16, #tpu.memory_space<vmem>>, vector<256x512xbf16>
    %cst = arith.constant dense<0.000000e+00> : vector<16x512xf32>
    %2 = tpu.matmul %0, %1, %cst {dimension_numbers = #tpu.dot_dimension_numbers<[1], [0], [0], [1], [0, 0, 1, 1], [], []>} : vector<16x256xbf16>, vector<256x512xbf16>, vector<16x512xf32> -> vector<16x512xf32>
    %c0_3 = arith.constant 0 : index
    %c0_4 = arith.constant 0 : index
    %3 = vector.load %arg2[%c0_3, %c0_4] : memref<16x128xbf16, #tpu.memory_space<vmem>>, vector<16x128xbf16>
    %c0_5 = arith.constant 0 : index
    %c0_6 = arith.constant 0 : index
    %4 = vector.load %arg4[%c0_5, %c0_6] : memref<128x512xbf16, #tpu.memory_space<vmem>>, vector<128x512xbf16>
    %cst_7 = arith.constant dense<0.000000e+00> : vector<16x512xf32>
    %5 = tpu.matmul %3, %4, %cst_7 {dimension_numbers = #tpu.dot_dimension_numbers<[1], [0], [0], [1], [0, 0, 1, 1], [], []>} : vector<16x128xbf16>, vector<128x512xbf16>, vector<16x512xf32> -> vector<16x512xf32>
    %6 = arith.addf %2, %5 : vector<16x512xf32>
    %c0_8 = arith.constant 0 : index
    %c0_9 = arith.constant 0 : index
    %7 = vector.load %arg5[%c0_8, %c0_9] : memref<1x512xf32, #tpu.memory_space<vmem>>, vector<1x512xf32>
    %8 = vector.broadcast %7 : vector<1x512xf32> to vector<16x512xf32>
    %9 = arith.addf %6, %8 : vector<16x512xf32>
    %cst_10 = arith.constant 2.000000e-01 : f32
    %10 = vector.broadcast %cst_10 : f32 to vector<16x512xf32>
    %11 = arith.mulf %10, %9 : vector<16x512xf32>
    %12 = arith.maximumf %9, %11 : vector<16x512xf32>
    %13 = arith.truncf %12 : vector<16x512xf32> to vector<16x512xbf16>
    %c0_11 = arith.constant 0 : index
    %c0_12 = arith.constant 0 : index
    %14 = vector.load %arg6[%c0_11, %c0_12] : memref<512x512xbf16, #tpu.memory_space<vmem>>, vector<512x512xbf16>
    %cst_13 = arith.constant dense<0.000000e+00> : vector<16x512xf32>
    %15 = tpu.matmul %13, %14, %cst_13 {dimension_numbers = #tpu.dot_dimension_numbers<[1], [0], [0], [1], [0, 0, 1, 1], [], []>} : vector<16x512xbf16>, vector<512x512xbf16>, vector<16x512xf32> -> vector<16x512xf32>
    %c0_14 = arith.constant 0 : index
    %c0_15 = arith.constant 0 : index
    %16 = vector.load %arg7[%c0_14, %c0_15] : memref<1x512xf32, #tpu.memory_space<vmem>>, vector<1x512xf32>
    %17 = vector.broadcast %16 : vector<1x512xf32> to vector<16x512xf32>
    %18 = arith.addf %15, %17 : vector<16x512xf32>
    %cst_16 = arith.constant 2.000000e-01 : f32
    %19 = vector.broadcast %cst_16 : f32 to vector<16x512xf32>
    %20 = arith.mulf %19, %18 : vector<16x512xf32>
    %21 = arith.maximumf %18, %20 : vector<16x512xf32>
    %c0_17 = arith.constant 0 : index
    %c0_18 = arith.constant 0 : index
    %22 = vector.load %arg8[%c0_17, %c0_18] : memref<1x512xbf16, #tpu.memory_space<vmem>>, vector<1x512xbf16>
    %23 = arith.truncf %21 : vector<16x512xf32> to vector<16x512xbf16>
    %cst_19 = arith.constant dense<0.000000e+00> : vector<1x16xf32>
    %24 = tpu.matmul %22, %23, %cst_19 {dimension_numbers = #tpu.dot_dimension_numbers<[1], [1], [0], [0], [0, 0, 1, 0], [], []>} : vector<1x512xbf16>, vector<16x512xbf16>, vector<1x16xf32> -> vector<1x16xf32>
    %c0_20 = arith.constant 0 : index
    %c0_21 = arith.constant 0 : index
    %25 = memref.load %arg9[%c0_20, %c0_21] : memref<1x1xf32, #tpu.memory_space<smem>>
    %26 = vector.broadcast %25 : f32 to vector<1x16xf32>
    %27 = arith.addf %24, %26 : vector<1x16xf32>
    %cst_22 = arith.constant -3.000000e+01 : f32
    %cst_23 = arith.constant 3.000000e+01 : f32
    %28 = vector.broadcast %cst_22 : f32 to vector<1x16xf32>
    %29 = arith.maximumf %28, %27 : vector<1x16xf32>
    %30 = vector.broadcast %cst_23 : f32 to vector<1x16xf32>
    %31 = arith.minimumf %30, %29 : vector<1x16xf32>
    %cst_24 = arith.constant 0.000000e+00 : f32
    %32 = vector.broadcast %cst_24 : f32 to vector<1x16xf32>
    %33 = arith.subf %32, %31 : vector<1x16xf32>
    %34 = math.exp %33 : vector<1x16xf32>
    %cst_25 = arith.constant 1.000000e+00 : f32
    %35 = vector.broadcast %cst_25 : f32 to vector<1x16xf32>
    %36 = arith.addf %35, %34 : vector<1x16xf32>
    %37 = tpu.reciprocal %36 {approx = true} : vector<1x16xf32> -> vector<1x16xf32>
    %38 = vector.shape_cast %37 : vector<1x16xf32> to vector<1x1x16xf32>
    %c0_26 = arith.constant 0 : index
    %c0_27 = arith.constant 0 : index
    %c0_28 = arith.constant 0 : index
    %39 = vector.load %arg10[%c0_26, %c0_27, %c0_28] : memref<1x1x16xf32, #tpu.memory_space<vmem>>, vector<1x1x16xf32>
    tpu.vector_store %arg10[%c0_26, %c0_27, %c0_28], %38 {strides = array<i32>} : memref<1x1x16xf32, #tpu.memory_space<vmem>>, vector<1x1x16xf32>,
    return
  }
  func.func @transform_0(%arg0: i32) -> (i32, i32) {
    %c0_i32 = arith.constant 0 : i32
    %c0_i32_0 = arith.constant 0 : i32
    return %arg0, %c0_i32 : i32, i32
  }
  func.func @transform_1(%arg0: i32) -> (i32, i32) {
    %c0_i32 = arith.constant 0 : i32
    %c0_i32_0 = arith.constant 0 : i32
    return %arg0, %c0_i32 : i32, i32
  }
  func.func @transform_2(%arg0: i32) -> (i32, i32) {
    %c0_i32 = arith.constant 0 : i32
    %c0_i32_0 = arith.constant 0 : i32
    %c0_i32_1 = arith.constant 0 : i32
    return %c0_i32, %c0_i32_0 : i32, i32
  }
  func.func @transform_3(%arg0: i32) -> (i32, i32) {
    %c0_i32 = arith.constant 0 : i32
    %c0_i32_0 = arith.constant 0 : i32
    %c0_i32_1 = arith.constant 0 : i32
    return %c0_i32, %c0_i32_0 : i32, i32
  }
  func.func @transform_4(%arg0: i32) -> (i32, i32) {
    %c0_i32 = arith.constant 0 : i32
    %c0_i32_0 = arith.constant 0 : i32
    %c0_i32_1 = arith.constant 0 : i32
    return %c0_i32, %c0_i32_0 : i32, i32
  }
  func.func @transform_5(%arg0: i32) -> (i32, i32) {
    %c0_i32 = arith.constant 0 : i32
    %c0_i32_0 = arith.constant 0 : i32
    %c0_i32_1 = arith.constant 0 : i32
    return %c0_i32, %c0_i32_0 : i32, i32
  }
  func.func @transform_6(%arg0: i32) -> (i32, i32) {
    %c0_i32 = arith.constant 0 : i32
    %c0_i32_0 = arith.constant 0 : i32
    %c0_i32_1 = arith.constant 0 : i32
    return %c0_i32, %c0_i32_0 : i32, i32
  }
  func.func @transform_7(%arg0: i32) -> (i32, i32) {
    %c0_i32 = arith.constant 0 : i32
    %c0_i32_0 = arith.constant 0 : i32
    %c0_i32_1 = arith.constant 0 : i32
    return %c0_i32, %c0_i32_0 : i32, i32
  }
  func.func @transform_8(%arg0: i32) -> (i32, i32) {
    %c0_i32 = arith.constant 0 : i32
    %c0_i32_0 = arith.constant 0 : i32
    %c0_i32_1 = arith.constant 0 : i32
    return %c0_i32, %c0_i32_0 : i32, i32
  }
  func.func @transform_9(%arg0: i32) -> (i32, i32, i32) {
    %c0_i32 = arith.constant 0 : i32
    %c0_i32_0 = arith.constant 0 : i32
    %c0_i32_1 = arith.constant 0 : i32
    return %arg0, %c0_i32, %c0_i32_0 : i32, i32, i32
  }
}

</mosaic_0001>

<bundles_post_ra>
// kernel: tpu_custom_call.1
= control target key start
LH: loop header
LB: loop body
LE: loop exit
PB: predicated region body
PF: predicated region fallthrough
CT: control target
= control target key end

     0   :  { %15 = vsyncpa [#allocation4], 0  ;;  %s2978_s0 = inlined_call_operand.hbm [shape: bf16[16,256], index: 0, kind: input, shape index: {}]   ;;  %s2979_s1 = inlined_call_operand.hbm [shape: bf16[16,128], index: 1, kind: input, shape index: {}]   ;;  %s2980_s2 = inlined_call_operand.hbm [shape: bf16[256,512], index: 2, kind: input, shape index: {}]   ;;  %s2981_s3 = inlined_call_operand.hbm [shape: bf16[128,512], index: 3, kind: input, shape index: {}]   ;;  %s2982_s4 = inlined_call_operand.vmem [shape: f32[1,512], index: 4, kind: input, shape index: {}]   ;;  %s2983_s5 = inlined_call_operand.hbm [shape: bf16[512,512], index: 5, kind: input, shape index: {}]   ;;  %s2984_s6 = inlined_call_operand.vmem [shape: f32[1,512], index: 6, kind: input, shape index: {}]   ;;  %s2985_s7 = inlined_call_operand.vmem [shape: bf16[1,512], index: 7, kind: input, shape index: {}]   ;;  %s2986_s8 = inlined_call_operand.<no memory space> [shape: f32[1,1], index: 8, kind: input, shape index: {}]   ;;  %s2987_s9 = inlined_call_operand.hbm [shape: f32[1,1,16], index: 9, kind: output, shape index: {}]  }
   0x1   :  { %16 = vsyncpa [#allocation7], 0 }
   0x2   :  { %17 = vsyncpa [#allocation10], 0 }
   0x3   :  { %18 = vsyncpa [#allocation5], 0  ;;  %s2794_s30 = smov [#allocation6]   ;;  %s2654_s13 = scalar_lea.hbm %s2979_s1, 128 }
   0x4   :  { %s36_s10 = sshll.u32 %s2794_s30, 4  ;;  %p2655_p0 = scmp.ne.s32.totalorder %s2979_s1, %s2654_s13  ;;  %s37_s10 = int_to_ptr.vmem [resolvable:$true] %s36_s10 }
   0x5   :  { %p2658_p1 = scmp.lt.u32.totalorder %s2654_s13, %s2979_s1 }
   0x7   :  { %p2660_p2 = pnand %p2658_p1, %p2655_p0 }
   0x9   :  { %2663 = shalt.err (!%p2660_p2)
}
   0xa   :  { %s2664_s18 = scalar_lea.vmem %s37_s10, 128  ;;  %p2669_p4 = scmp.lt.s32.totalorder %s37_s10, %s37_s10 }
   0xb   :  { %p2665_p3 = scmp.ne.s32.totalorder %s37_s10, %s2664_s18  ;;  %p2670_p5 = scmp.lt.s32.totalorder %s2664_s18, %s2664_s18 }
   0xd   :  { %p2671_p6 = por %p2670_p5, %p2669_p4 }
   0xf   :  { %p2672_p7 = pnand %p2671_p6, %p2665_p3 }
  0x11   :  { %2675 = shalt.err (!%p2672_p7)
}
  0x12   :  { %s2795_s19 = smov 64   ;;  %s2796_s20 = smov 4  }
  0x13   :  { %42 = dma.hbm_to_vmem [thread:$0]  %s2979_s1, 128, %s37_s10, [#allocation7], %s2795_s19, %s2795_s19, %s2796_s20  }
  0x14   :  { %s2797_s23 = smov [#allocation9]   ;;  %s2798_s25 = smov [#allocation3]  }
  0x15   :  { %s60_s24 = sshll.u32 %s2797_s23, 4  ;;  %s24_s26 = sshll.u32 %s2798_s25, 4  ;;  %s61_s24 = int_to_ptr.vmem [resolvable:$true] %s60_s24  ;;  %s25_s26 = int_to_ptr.vmem [resolvable:$true] %s24_s26 }
  0x16   :  { %s2676_s29 = scalar_lea.hbm %s2981_s3, 4096 }
  0x17   :  { %p2677_p8 = scmp.ne.s32.totalorder %s2981_s3, %s2676_s29  ;;  %p2680_p9 = scmp.lt.u32.totalorder %s2676_s29, %s2981_s3 }
  0x19   :  { %p2682_p10 = pnand %p2680_p9, %p2677_p8 }
  0x1b   :  { %2685 = shalt.err (!%p2682_p10)
}
  0x1c   :  { %s2686_s1 = scalar_lea.vmem %s61_s24, 4096  ;;  %p2691_p12 = scmp.lt.s32.totalorder %s61_s24, %s61_s24 }
  0x1d   :  { %p2687_p11 = scmp.ne.s32.totalorder %s61_s24, %s2686_s1  ;;  %p2692_p13 = scmp.lt.s32.totalorder %s2686_s1, %s2686_s1 }
  0x1f   :  { %p2693_p0 = por %p2692_p13, %p2691_p12 }
  0x21   :  { %p2694_p1 = pnand %p2693_p0, %p2687_p11 }
  0x23   :  { %2697 = shalt.err (!%p2694_p1)
}
  0x24   :  { %s2799_s10 = smov 256   ;;  %s2800_s14 = smov 16  }
  0x25   :  { %66 = dma.hbm_to_vmem [thread:$0]  %s2981_s3, 4096, %s61_s24, [#allocation10], %s2799_s10, %s2799_s10, %s2800_s14  }
  0x26   :  { %s2698_s19 = scalar_lea.hbm %s2978_s0, 256 }
  0x27   :  { %p2699_p2 = scmp.ne.s32.totalorder %s2978_s0, %s2698_s19  ;;  %p2702_p3 = scmp.lt.u32.totalorder %s2698_s19, %s2978_s0 }
  0x29   :  { %p2704_p4 = pnand %p2702_p3, %p2699_p2 }
  0x2b   :  { %2707 = shalt.err (!%p2704_p4)
}
  0x2c   :  { %s2708_s25 = scalar_lea.vmem %s25_s26, 256  ;;  %p2713_p6 = scmp.lt.s32.totalorder %s25_s26, %s25_s26 }
  0x2d   :  { %p2709_p5 = scmp.ne.s32.totalorder %s25_s26, %s2708_s25  ;;  %p2714_p7 = scmp.lt.s32.totalorder %s2708_s25, %s2708_s25 }
  0x2f   :  { %p2715_p8 = por %p2714_p7, %p2713_p6 }
  0x31   :  { %p2716_p9 = pnand %p2715_p8, %p2709_p5 }
  0x33   :  { %2719 = shalt.err (!%p2716_p9)
}
  0x34   :  { %s2801_s3 = smov 128   ;;  %s2802_s24 = smov 8  }
  0x35   :  { %30 = dma.hbm_to_vmem [thread:$0]  %s2978_s0, 256, %s25_s26, [#allocation4], %s2801_s3, %s2801_s3, %s2802_s24  }
  0x36   :  { %s2803_s29 = smov [#allocation8]   ;;  %s2804_s11 = smov [#allocation11]  }
  0x37   :  { %s48_s30 = sshll.u32 %s2803_s29, 4  ;;  %s74_s12 = sshll.u32 %s2804_s11, 4  ;;  %s49_s30 = int_to_ptr.vmem [resolvable:$true] %s48_s30  ;;  %s75_s12 = int_to_ptr.vmem [resolvable:$true] %s74_s12 }
  0x38   :  { %s2720_s15 = scalar_lea.hbm %s2980_s2, 8192 }
  0x39   :  { %p2721_p10 = scmp.ne.s32.totalorder %s2980_s2, %s2720_s15  ;;  %p2724_p11 = scmp.lt.u32.totalorder %s2720_s15, %s2980_s2 }
  0x3b   :  { %p2726_p12 = pnand %p2724_p11, %p2721_p10 }
  0x3d   :  { %2729 = shalt.err (!%p2726_p12)
}
  0x3e   :  { %s2730_s0 = scalar_lea.vmem %s49_s30, 8192  ;;  %p2735_p0 = scmp.lt.s32.totalorder %s49_s30, %s49_s30 }
  0x3f   :  { %p2731_p13 = scmp.ne.s32.totalorder %s49_s30, %s2730_s0  ;;  %p2736_p1 = scmp.lt.s32.totalorder %s2730_s0, %s2730_s0 }
  0x41   :  { %p2737_p2 = por %p2736_p1, %p2735_p0 }
  0x43   :  { %p2738_p3 = pnand %p2737_p2, %p2731_p13 }
  0x45   :  { %2741 = shalt.err (!%p2738_p3)
}
  0x46   :  { %54 = dma.hbm_to_vmem [thread:$0]  %s2980_s2, 8192, %s49_s30, [#allocation7], %s2799_s10, %s2799_s10, %s2800_s14  }
  0x47   :  { %s2742_s23 = scalar_lea.hbm %s2983_s5, 16384 }
  0x48   :  { %p2743_p4 = scmp.ne.s32.totalorder %s2983_s5, %s2742_s23  ;;  %p2746_p5 = scmp.lt.u32.totalorder %s2742_s23, %s2983_s5 }
  0x4a   :  { %p2748_p6 = pnand %p2746_p5, %p2743_p4 }
  0x4c   :  { %2751 = shalt.err (!%p2748_p6)
}
  0x4d   :  { %s2752_s28 = scalar_lea.vmem %s75_s12, 16384  ;;  %p2757_p8 = scmp.lt.s32.totalorder %s75_s12, %s75_s12 }
  0x4e   :  { %p2753_p7 = scmp.ne.s32.totalorder %s75_s12, %s2752_s28  ;;  %p2758_p9 = scmp.lt.s32.totalorder %s2752_s28, %s2752_s28 }
  0x50   :  { %p2759_p10 = por %p2758_p9, %p2757_p8 }
  0x52   :  { %p2760_p11 = pnand %p2759_p10, %p2753_p7 }
  0x54   :  { %2763 = shalt.err (!%p2760_p11)
}
  0x55   :  { %80 = dma.hbm_to_vmem [thread:$0]  %s2983_s5, 16384, %s75_s12, [#allocation10], %s2799_s10, %s2799_s10, %s2800_s14  }
  0x56   :  { %2786 = dma.done.wait [#allocation4], 256  }
  0x57   :  { %2787 = vsyncadd [#allocation4], 4294967040 }
  0x58   :  { %2788 = dma.done.wait [#allocation7], 8320  }
  0x59   :  { %2789 = vsyncadd [#allocation7], 4294958976 }
  0x5a   :  { %2790 = dma.done.wait [#allocation10], 20480  }
  0x5b   :  { %2791 = vsyncadd [#allocation10], 4294946816  ;;  %v2805_v0 = vmov 0   ;;  %v2310_v1 = vld [vmem:[#allocation9 + $0x4] ss:$16 sps:$4 sm:$0xff]   ;;  %v2364_v36 = vld [vmem:[#allocation6] sm:$0xff]  }
  0x5c   :  { %401 = vmatprep.mubr.bf16.mxu0 %v2805_v0  ;;  %444 = vmatprep.mubr.bf16.mxu1 %v2805_v0  ;;  %v2312_v2 = vld [vmem:[#allocation9 + $0xc] ss:$16 sps:$4 sm:$0xff]   ;;  %v2314_v3 = vld [vmem:[#allocation9] ss:$16 sps:$4 sm:$0xff]   ;;  %v2315_v4 = vld [vmem:[#allocation9 + $0x8] ss:$16 sps:$4 sm:$0xff]  }
  0x5d   :  { %369 = vmatprep.subr.bf16.mxu0 %v2310_v1  ;;  %412 = vmatprep.subr.bf16.mxu1 %v2312_v2  ;;  %v2316_v5 = vld [vmem:[#allocation9 + $0x24] ss:$16 sps:$4 sm:$0xff]   ;;  %v2318_v6 = vld [vmem:[#allocation9 + $0x2c] ss:$16 sps:$4 sm:$0xff]   ;;  %v2320_v7 = vld [vmem:[#allocation9 + $0x20] ss:$16 sps:$4 sm:$0xff]  }
  0x5e   :  { %370 = vmatpush1.bf16.msra.mxu0 %v2314_v3  ;;  %413 = vmatpush1.bf16.msra.mxu1 %v2315_v4  ;;  %v2321_v8 = vld [vmem:[#allocation9 + $0x28] ss:$16 sps:$4 sm:$0xff]   ;;  %v2322_v9 = vld [vmem:[#allocation9 + $0x44] ss:$16 sps:$4 sm:$0xff]   ;;  %v2324_v10 = vld [vmem:[#allocation9 + $0x4c] ss:$16 sps:$4 sm:$0xff]  }
  0x5f   :  { %371 = vmatprep.subr.bf16.mxu0 %v2316_v5  ;;  %414 = vmatprep.subr.bf16.mxu1 %v2318_v6  ;;  %v2326_v11 = vld [vmem:[#allocation9 + $0x40] ss:$16 sps:$4 sm:$0xff]   ;;  %v2327_v12 = vld [vmem:[#allocation9 + $0x48] ss:$16 sps:$4 sm:$0xff]   ;;  %v2328_v13 = vld [vmem:[#allocation9 + $0x64] ss:$16 sps:$4 sm:$0xff]  }
  0x60   :  { %v2330_v14 = vld [vmem:[#allocation9 + $0x6c] ss:$16 sps:$4 sm:$0xff]   ;;  %v2332_v15 = vld [vmem:[#allocation9 + $0x60] ss:$16 sps:$4 sm:$0xff]   ;;  %v2333_v16 = vld [vmem:[#allocation9 + $0x68] ss:$16 sps:$4 sm:$0xff]  }
  0x61   :  { %v2334_v17 = vld [vmem:[#allocation9 + $0x84] ss:$16 sps:$4 sm:$0xff]   ;;  %v2336_v18 = vld [vmem:[#allocation9 + $0x8c] ss:$16 sps:$4 sm:$0xff]   ;;  %v2338_v19 = vld [vmem:[#allocation9 + $0x80] ss:$16 sps:$4 sm:$0xff]  }
  0x62   :  { %372 = vmatpush1.bf16.msra.mxu0 %v2320_v7  ;;  %415 = vmatpush1.bf16.msra.mxu1 %v2321_v8  ;;  %v2339_v20 = vld [vmem:[#allocation9 + $0x88] ss:$16 sps:$4 sm:$0xff]   ;;  %v2340_v21 = vld [vmem:[#allocation9 + $0xa4] ss:$16 sps:$4 sm:$0xff]   ;;  %v2342_v22 = vld [vmem:[#allocation9 + $0xac] ss:$16 sps:$4 sm:$0xff]  }
  0x63   :  { %373 = vmatprep.subr.bf16.mxu0 %v2322_v9  ;;  %416 = vmatprep.subr.bf16.mxu1 %v2324_v10  ;;  %v2344_v23 = vld [vmem:[#allocation9 + $0xa0] ss:$16 sps:$4 sm:$0xff]   ;;  %v2345_v24 = vld [vmem:[#allocation9 + $0xa8] ss:$16 sps:$4 sm:$0xff]   ;;  %v2346_v25 = vld [vmem:[#allocation9 + $0xc4] ss:$16 sps:$4 sm:$0xff]  }
  0x64   :  { %v2348_v26 = vld [vmem:[#allocation9 + $0xcc] ss:$16 sps:$4 sm:$0xff]   ;;  %v2350_v27 = vld [vmem:[#allocation9 + $0xc0] ss:$16 sps:$4 sm:$0xff]   ;;  %v2351_v28 = vld [vmem:[#allocation9 + $0xc8] ss:$16 sps:$4 sm:$0xff]  }
  0x65   :  { %v2352_v29 = vld [vmem:[#allocation9 + $0xe4] ss:$16 sps:$4 sm:$0xff]   ;;  %v2354_v30 = vld [vmem:[#allocation9 + $0xec] ss:$16 sps:$4 sm:$0xff]   ;;  %v2356_v31 = vld [vmem:[#allocation9 + $0xe0] ss:$16 sps:$4 sm:$0xff]  }
  0x66   :  { %374 = vmatpush1.bf16.msra.mxu0 %v2326_v11  ;;  %417 = vmatpush1.bf16.msra.mxu1 %v2327_v12  ;;  %v2357_v32 = vld [vmem:[#allocation9 + $0xe8] ss:$16 sps:$4 sm:$0xff]   ;;  %v2360_v33 = vld [vmem:[#allocation8 + $0x4] ss:$16 sps:$4 sm:$0xff]   ;;  %v2363_v34 = vld [vmem:[#allocation8 + $0xc] ss:$16 sps:$4 sm:$0xff]  }
  0x67   :  { %375 = vmatprep.subr.bf16.mxu0 %v2328_v13  ;;  %418 = vmatprep.subr.bf16.mxu1 %v2330_v14  ;;  %v2358_v35 = vld [vmem:[#allocation8] ss:$16 sps:$4 sm:$0xff]   ;;  %v2361_v37 = vld [vmem:[#allocation8 + $0x8] ss:$16 sps:$4 sm:$0xff]   ;;  %v2367_v38 = vld [vmem:[#allocation8 + $0x24] ss:$16 sps:$4 sm:$0xff]  }
  0x68   :  { %v2370_v39 = vld [vmem:[#allocation8 + $0x2c] ss:$16 sps:$4 sm:$0xff]   ;;  %v2365_v40 = vld [vmem:[#allocation8 + $0x20] ss:$16 sps:$4 sm:$0xff]   ;;  %v2368_v41 = vld [vmem:[#allocation8 + $0x28] ss:$16 sps:$4 sm:$0xff]  }
  0x69   :  { %v2373_v42 = vld [vmem:[#allocation8 + $0x44] ss:$16 sps:$4 sm:$0xff]   ;;  %v2376_v43 = vld [vmem:[#allocation8 + $0x4c] ss:$16 sps:$4 sm:$0xff]   ;;  %v2371_v44 = vld [vmem:[#allocation8 + $0x40] ss:$16 sps:$4 sm:$0xff]  }
  0x6a   :  { %376 = vmatpush1.bf16.msra.mxu0 %v2332_v15  ;;  %419 = vmatpush1.bf16.msra.mxu1 %v2333_v16  ;;  %v2374_v45 = vld [vmem:[#allocation8 + $0x48] ss:$16 sps:$4 sm:$0xff]   ;;  %v2379_v46 = vld [vmem:[#allocation8 + $0x64] ss:$16 sps:$4 sm:$0xff]   ;;  %v2382_v47 = vld [vmem:[#allocation8 + $0x6c] ss:$16 sps:$4 sm:$0xff]  }
  0x6b   :  { %377 = vmatprep.subr.bf16.mxu0 %v2334_v17  ;;  %420 = vmatprep.subr.bf16.mxu1 %v2336_v18  ;;  %v2377_v48 = vld [vmem:[#allocation8 + $0x60] ss:$16 sps:$4 sm:$0xff]   ;;  %v2380_v49 = vld [vmem:[#allocation8 + $0x68] ss:$16 sps:$4 sm:$0xff]   ;;  %v2385_v50 = vld [vmem:[#allocation8 + $0x84] ss:$16 sps:$4 sm:$0xff]  }
  0x6c   :  { %v2388_v51 = vld [vmem:[#allocation8 + $0x8c] ss:$16 sps:$4 sm:$0xff]   ;;  %v2383_v52 = vld [vmem:[#allocation8 + $0x80] ss:$16 sps:$4 sm:$0xff]   ;;  %v2386_v53 = vld [vmem:[#allocation8 + $0x88] ss:$16 sps:$4 sm:$0xff]  }
  0x6d   :  { %v2391_v54 = vld [vmem:[#allocation8 + $0xa4] ss:$16 sps:$4 sm:$0xff]   ;;  %v2394_v55 = vld [vmem:[#allocation8 + $0xac] ss:$16 sps:$4 sm:$0xff]   ;;  %v2389_v56 = vld [vmem:[#allocation8 + $0xa0] ss:$16 sps:$4 sm:$0xff]  }
  0x6e   :  { %378 = vmatpush1.bf16.msra.mxu0 %v2338_v19  ;;  %421 = vmatpush1.bf16.msra.mxu1 %v2339_v20  ;;  %v2392_v57 = vld [vmem:[#allocation8 + $0xa8] ss:$16 sps:$4 sm:$0xff]   ;;  %v2397_v58 = vld [vmem:[#allocation8 + $0xc4] ss:$16 sps:$4 sm:$0xff]   ;;  %v2400_v59 = vld [vmem:[#allocation8 + $0xcc] ss:$16 sps:$4 sm:$0xff]  }
  0x6f   :  { %379 = vmatprep.subr.bf16.mxu0 %v2340_v21  ;;  %422 = vmatprep.subr.bf16.mxu1 %v2342_v22  ;;  %v2395_v60 = vld [vmem:[#allocation8 + $0xc0] ss:$16 sps:$4 sm:$0xff]   ;;  %v2398_v61 = vld [vmem:[#allocation8 + $0xc8] ss:$16 sps:$4 sm:$0xff]   ;;  %v2403_v62 = vld [vmem:[#allocation8 + $0xe4] ss:$16 sps:$4 sm:$0xff]  }
  0x70   :  { %v2406_v63 = vld [vmem:[#allocation8 + $0xec] ss:$16 sps:$4 sm:$0xff]   ;;  %v2401_v0 = vld [vmem:[#allocation8 + $0xe0] ss:$16 sps:$4 sm:$0xff]   ;;  %v2404_v1 = vld [vmem:[#allocation8 + $0xe8] ss:$16 sps:$4 sm:$0xff]  }
  0x71   :  { %v2409_v2 = vld [vmem:[#allocation8 + $0x104] ss:$16 sps:$4 sm:$0xff]   ;;  %v2412_v3 = vld [vmem:[#allocation8 + $0x10c] ss:$16 sps:$4 sm:$0xff]   ;;  %v2407_v4 = vld [vmem:[#allocation8 + $0x100] ss:$16 sps:$4 sm:$0xff]  }
  0x72   :  { %380 = vmatpush1.bf16.msra.mxu0 %v2344_v23  ;;  %423 = vmatpush1.bf16.msra.mxu1 %v2345_v24  ;;  %v2410_v5 = vld [vmem:[#allocation8 + $0x108] ss:$16 sps:$4 sm:$0xff]   ;;  %v2415_v6 = vld [vmem:[#allocation8 + $0x124] ss:$16 sps:$4 sm:$0xff]   ;;  %v2418_v7 = vld [vmem:[#allocation8 + $0x12c] ss:$16 sps:$4 sm:$0xff]  }
  0x73   :  { %381 = vmatprep.subr.bf16.mxu0 %v2346_v25  ;;  %424 = vmatprep.subr.bf16.mxu1 %v2348_v26  ;;  %v2457_v8 = vld [vmem:[#allocation3 + $0x4] ss:$8 sps:$4 sm:$0xff]   ;;  %v2413_v9 = vld [vmem:[#allocation8 + $0x120] ss:$16 sps:$4 sm:$0xff]   ;;  %v2416_v10 = vld [vmem:[#allocation8 + $0x128] ss:$16 sps:$4 sm:$0xff]  }
  0x74   :  { %v2421_v11 = vld [vmem:[#allocation8 + $0x144] ss:$16 sps:$4 sm:$0xff]   ;;  %v2424_v12 = vld [vmem:[#allocation8 + $0x14c] ss:$16 sps:$4 sm:$0xff]   ;;  %v2419_v13 = vld [vmem:[#allocation8 + $0x140] ss:$16 sps:$4 sm:$0xff]  }
  0x75   :  { %v2422_v14 = vld [vmem:[#allocation8 + $0x148] ss:$16 sps:$4 sm:$0xff]   ;;  %v2427_v15 = vld [vmem:[#allocation8 + $0x164] ss:$16 sps:$4 sm:$0xff]   ;;  %v2430_v16 = vld [vmem:[#allocation8 + $0x16c] ss:$16 sps:$4 sm:$0xff]  }
  0x76   :  { %382 = vmatpush1.bf16.msra.mxu0 %v2350_v27  ;;  %425 = vmatpush1.bf16.msra.mxu1 %v2351_v28  ;;  %v2425_v17 = vld [vmem:[#allocation8 + $0x160] ss:$16 sps:$4 sm:$0xff]   ;;  %v2428_v18 = vld [vmem:[#allocation8 + $0x168] ss:$16 sps:$4 sm:$0xff]   ;;  %v2433_v19 = vld [vmem:[#allocation8 + $0x184] ss:$16 sps:$4 sm:$0xff]  }
  0x77   :  { %383 = vmatprep.subr.bf16.mxu0 %v2352_v29  ;;  %426 = vmatprep.subr.bf16.mxu1 %v2354_v30  ;;  %v2436_v20 = vld [vmem:[#allocation8 + $0x18c] ss:$16 sps:$4 sm:$0xff]   ;;  %v2431_v21 = vld [vmem:[#allocation8 + $0x180] ss:$16 sps:$4 sm:$0xff]   ;;  %v2434_v22 = vld [vmem:[#allocation8 + $0x188] ss:$16 sps:$4 sm:$0xff]  }
  0x78   :  { %v2439_v23 = vld [vmem:[#allocation8 + $0x1a4] ss:$16 sps:$4 sm:$0xff]   ;;  %v2442_v24 = vld [vmem:[#allocation8 + $0x1ac] ss:$16 sps:$4 sm:$0xff]   ;;  %v2437_v25 = vld [vmem:[#allocation8 + $0x1a0] ss:$16 sps:$4 sm:$0xff]  }
  0x79   :  { %v2440_v26 = vld [vmem:[#allocation8 + $0x1a8] ss:$16 sps:$4 sm:$0xff]   ;;  %v2445_v27 = vld [vmem:[#allocation8 + $0x1c4] ss:$16 sps:$4 sm:$0xff]   ;;  %v2448_v28 = vld [vmem:[#allocation8 + $0x1cc] ss:$16 sps:$4 sm:$0xff]  }
  0x7a   :  { %384 = vmatpush1.bf16.msra.mxu0 %v2356_v31  ;;  %427 = vmatpush1.bf16.msra.mxu1 %v2357_v32  ;;  %v2443_v29 = vld [vmem:[#allocation8 + $0x1c0] ss:$16 sps:$4 sm:$0xff]   ;;  %v2446_v30 = vld [vmem:[#allocation8 + $0x1c8] ss:$16 sps:$4 sm:$0xff]   ;;  %v2451_v31 = vld [vmem:[#allocation8 + $0x1e4] ss:$16 sps:$4 sm:$0xff]  }
  0x7b   :  { %785 = vmatprep.subr.bf16.mxu0 %v2360_v33  ;;  %828 = vmatprep.subr.bf16.mxu1 %v2363_v34  ;;  %v2454_v32 = vld [vmem:[#allocation8 + $0x1ec] ss:$16 sps:$4 sm:$0xff]   ;;  %v2449_v33 = vld [vmem:[#allocation8 + $0x1e0] ss:$16 sps:$4 sm:$0xff]   ;;  %v2452_v34 = vld [vmem:[#allocation8 + $0x1e8] ss:$16 sps:$4 sm:$0xff]  }
  0x7c   :  { %s2807_s12 = smov [#allocation12]   ;;  %vm2022_vm0 = vcmask 122880  }
  0x7d   :  { %402 = vmatmul.mubr.bf16.vlgmr.msra.gmra.mrb[0].mxu0 %v2364_v36  ;;  %445 = vmatmul.mubr.bf16.vlgmr.msra.gmra.mrb[0].mxu1 %v2364_v36  ;;  %v2463_v36 = vld [vmem:[#allocation11 + $0xc] ss:$16 sps:$4 sm:$0xff]   ;;  %s2030_s13 = sshll.u32 %s2807_s12, 4  ;;  %s2031_s13 = int_to_ptr.vmem [resolvable:$true] %s2030_s13 }
  0x7e   :  { %786 = vmatpush1.bf16.msra.mxu0 %v2358_v35  ;;  %829 = vmatpush1.bf16.msra.mxu1 %v2361_v37  ;;  %v2460_v35 = vld [vmem:[#allocation11 + $0x4] ss:$16 sps:$4 sm:$0xff]   ;;  %v2455_v37 = vld [vmem:[#allocation3] ss:$8 sps:$4 sm:$0xff]   ;;  %s2768_s1 = scalar_lea.vmem %s2031_s13, 32  ;;  %p2769_p13 = scmp.lt.s32.totalorder %s2031_s13, %s2031_s13 }
  0x7f   :  { %787 = vmatprep.subr.bf16.mxu0 %v2367_v38  ;;  %830 = vmatprep.subr.bf16.mxu1 %v2370_v39  ;;  %v2458_v38 = vld [vmem:[#allocation11] ss:$16 sps:$4 sm:$0xff]   ;;  %v2461_v39 = vld [vmem:[#allocation11 + $0x8] ss:$16 sps:$4 sm:$0xff]  }
  0x80   :  { %817 = vmatprep.mubr.bf16.mxu0 %v2457_v8  ;;  %860 = vmatprep.mubr.bf16.mxu1 %v2457_v8  ;;  %v2514_v8 = vld [vmem:[#allocation11 + $0x124] ss:$16 sps:$4 sm:$0xff]  }
  0x82   :  { %788 = vmatpush1.bf16.msra.mxu0 %v2365_v40  ;;  %831 = vmatpush1.bf16.msra.mxu1 %v2368_v41  ;;  %v2466_v40 = vld [vmem:[#allocation11 + $0x24] ss:$16 sps:$4 sm:$0xff]   ;;  %v2469_v41 = vld [vmem:[#allocation11 + $0x2c] ss:$16 sps:$4 sm:$0xff]  }
  0x83   :  { %789 = vmatprep.subr.bf16.mxu0 %v2373_v42  ;;  %832 = vmatprep.subr.bf16.mxu1 %v2376_v43  ;;  %v2464_v42 = vld [vmem:[#allocation11 + $0x20] ss:$16 sps:$4 sm:$0xff]   ;;  %v2467_v43 = vld [vmem:[#allocation11 + $0x28] ss:$16 sps:$4 sm:$0xff]  }
  0x86   :  { %790 = vmatpush1.bf16.msra.mxu0 %v2371_v44  ;;  %833 = vmatpush1.bf16.msra.mxu1 %v2374_v45  ;;  %v2472_v44 = vld [vmem:[#allocation11 + $0x44] ss:$16 sps:$4 sm:$0xff]   ;;  %v2475_v45 = vld [vmem:[#allocation11 + $0x4c] ss:$16 sps:$4 sm:$0xff]  }
  0x87   :  { %791 = vmatprep.subr.bf16.mxu0 %v2379_v46  ;;  %834 = vmatprep.subr.bf16.mxu1 %v2382_v47  ;;  %v2470_v46 = vld [vmem:[#allocation11 + $0x40] ss:$16 sps:$4 sm:$0xff]   ;;  %v2473_v47 = vld [vmem:[#allocation11 + $0x48] ss:$16 sps:$4 sm:$0xff]  }
  0x8a   :  { %792 = vmatpush1.bf16.msra.mxu0 %v2377_v48  ;;  %835 = vmatpush1.bf16.msra.mxu1 %v2380_v49  ;;  %v2478_v48 = vld [vmem:[#allocation11 + $0x64] ss:$16 sps:$4 sm:$0xff]   ;;  %v2481_v49 = vld [vmem:[#allocation11 + $0x6c] ss:$16 sps:$4 sm:$0xff]  }
  0x8b   :  { %793 = vmatprep.subr.bf16.mxu0 %v2385_v50  ;;  %836 = vmatprep.subr.bf16.mxu1 %v2388_v51  ;;  %v2476_v50 = vld [vmem:[#allocation11 + $0x60] ss:$16 sps:$4 sm:$0xff]   ;;  %v2479_v51 = vld [vmem:[#allocation11 + $0x68] ss:$16 sps:$4 sm:$0xff]  }
  0x8e   :  { %794 = vmatpush1.bf16.msra.mxu0 %v2383_v52  ;;  %837 = vmatpush1.bf16.msra.mxu1 %v2386_v53  ;;  %v2484_v52 = vld [vmem:[#allocation11 + $0x84] ss:$16 sps:$4 sm:$0xff]   ;;  %v2487_v53 = vld [vmem:[#allocation11 + $0x8c] ss:$16 sps:$4 sm:$0xff]  }
  0x8f   :  { %795 = vmatprep.subr.bf16.mxu0 %v2391_v54  ;;  %838 = vmatprep.subr.bf16.mxu1 %v2394_v55  ;;  %v2482_v54 = vld [vmem:[#allocation11 + $0x80] ss:$16 sps:$4 sm:$0xff]   ;;  %v2485_v55 = vld [vmem:[#allocation11 + $0x88] ss:$16 sps:$4 sm:$0xff]  }
  0x92   :  { %796 = vmatpush1.bf16.msra.mxu0 %v2389_v56  ;;  %839 = vmatpush1.bf16.msra.mxu1 %v2392_v57  ;;  %v2490_v56 = vld [vmem:[#allocation11 + $0xa4] ss:$16 sps:$4 sm:$0xff]   ;;  %v2493_v57 = vld [vmem:[#allocation11 + $0xac] ss:$16 sps:$4 sm:$0xff]  }
  0x93   :  { %797 = vmatprep.subr.bf16.mxu0 %v2397_v58  ;;  %840 = vmatprep.subr.bf16.mxu1 %v2400_v59  ;;  %v2488_v58 = vld [vmem:[#allocation11 + $0xa0] ss:$16 sps:$4 sm:$0xff]   ;;  %v2491_v59 = vld [vmem:[#allocation11 + $0xa8] ss:$16 sps:$4 sm:$0xff]  }
  0x96   :  { %798 = vmatpush1.bf16.msra.mxu0 %v2395_v60  ;;  %841 = vmatpush1.bf16.msra.mxu1 %v2398_v61  ;;  %v2496_v60 = vld [vmem:[#allocation11 + $0xc4] ss:$16 sps:$4 sm:$0xff]   ;;  %v2499_v61 = vld [vmem:[#allocation11 + $0xcc] ss:$16 sps:$4 sm:$0xff]  }
  0x97   :  { %799 = vmatprep.subr.bf16.mxu0 %v2403_v62  ;;  %842 = vmatprep.subr.bf16.mxu1 %v2406_v63  ;;  %v2494_v62 = vld [vmem:[#allocation11 + $0xc0] ss:$16 sps:$4 sm:$0xff]   ;;  %v2497_v63 = vld [vmem:[#allocation11 + $0xc8] ss:$16 sps:$4 sm:$0xff]  }
  0x9a   :  { %800 = vmatpush1.bf16.msra.mxu0 %v2401_v0  ;;  %843 = vmatpush1.bf16.msra.mxu1 %v2404_v1  ;;  %v2502_v0 = vld [vmem:[#allocation11 + $0xe4] ss:$16 sps:$4 sm:$0xff]   ;;  %v2505_v1 = vld [vmem:[#allocation11 + $0xec] ss:$16 sps:$4 sm:$0xff]  }
  0x9b   :  { %801 = vmatprep.subr.bf16.mxu0 %v2409_v2  ;;  %844 = vmatprep.subr.bf16.mxu1 %v2412_v3  ;;  %v2500_v2 = vld [vmem:[#allocation11 + $0xe0] ss:$16 sps:$4 sm:$0xff]   ;;  %v2503_v3 = vld [vmem:[#allocation11 + $0xe8] ss:$16 sps:$4 sm:$0xff]  }
  0x9e   :  { %802 = vmatpush1.bf16.msra.mxu0 %v2407_v4  ;;  %845 = vmatpush1.bf16.msra.mxu1 %v2410_v5  ;;  %v2508_v4 = vld [vmem:[#allocation11 + $0x104] ss:$16 sps:$4 sm:$0xff]   ;;  %v2511_v5 = vld [vmem:[#allocation11 + $0x10c] ss:$16 sps:$4 sm:$0xff]  }
  0x9f   :  { %803 = vmatprep.subr.bf16.mxu0 %v2415_v6  ;;  %846 = vmatprep.subr.bf16.mxu1 %v2418_v7  ;;  %v2506_v6 = vld [vmem:[#allocation11 + $0x100] ss:$16 sps:$4 sm:$0xff]   ;;  %v2509_v7 = vld [vmem:[#allocation11 + $0x108] ss:$16 sps:$4 sm:$0xff]  }
  0xa2   :  { %804 = vmatpush1.bf16.msra.mxu0 %v2413_v9  ;;  %847 = vmatpush1.bf16.msra.mxu1 %v2416_v10  ;;  %v2517_v9 = vld [vmem:[#allocation11 + $0x12c] ss:$16 sps:$4 sm:$0xff]   ;;  %v2512_v10 = vld [vmem:[#allocation11 + $0x120] ss:$16 sps:$4 sm:$0xff]  }
  0xa3   :  { %805 = vmatprep.subr.bf16.mxu0 %v2421_v11  ;;  %848 = vmatprep.subr.bf16.mxu1 %v2424_v12  ;;  %v2515_v11 = vld [vmem:[#allocation11 + $0x128] ss:$16 sps:$4 sm:$0xff]   ;;  %v2520_v12 = vld [vmem:[#allocation11 + $0x144] ss:$16 sps:$4 sm:$0xff]  }
  0xa6   :  { %806 = vmatpush1.bf16.msra.mxu0 %v2419_v13  ;;  %849 = vmatpush1.bf16.msra.mxu1 %v2422_v14  ;;  %v2523_v13 = vld [vmem:[#allocation11 + $0x14c] ss:$16 sps:$4 sm:$0xff]   ;;  %v2518_v14 = vld [vmem:[#allocation11 + $0x140] ss:$16 sps:$4 sm:$0xff]  }
  0xa7   :  { %807 = vmatprep.subr.bf16.mxu0 %v2427_v15  ;;  %850 = vmatprep.subr.bf16.mxu1 %v2430_v16  ;;  %v2521_v15 = vld [vmem:[#allocation11 + $0x148] ss:$16 sps:$4 sm:$0xff]   ;;  %v2526_v16 = vld [vmem:[#allocation11 + $0x164] ss:$16 sps:$4 sm:$0xff]  }
  0xaa   :  { %808 = vmatpush1.bf16.msra.mxu0 %v2425_v17  ;;  %851 = vmatpush1.bf16.msra.mxu1 %v2428_v18  ;;  %v2529_v17 = vld [vmem:[#allocation11 + $0x16c] ss:$16 sps:$4 sm:$0xff]   ;;  %v2524_v18 = vld [vmem:[#allocation11 + $0x160] ss:$16 sps:$4 sm:$0xff]  }
  0xab   :  { %809 = vmatprep.subr.bf16.mxu0 %v2433_v19  ;;  %852 = vmatprep.subr.bf16.mxu1 %v2436_v20  ;;  %v2527_v19 = vld [vmem:[#allocation11 + $0x168] ss:$16 sps:$4 sm:$0xff]   ;;  %v2532_v20 = vld [vmem:[#allocation11 + $0x184] ss:$16 sps:$4 sm:$0xff]  }
  0xae   :  { %810 = vmatpush1.bf16.msra.mxu0 %v2431_v21  ;;  %853 = vmatpush1.bf16.msra.mxu1 %v2434_v22  ;;  %v2535_v21 = vld [vmem:[#allocation11 + $0x18c] ss:$16 sps:$4 sm:$0xff]   ;;  %v2530_v22 = vld [vmem:[#allocation11 + $0x180] ss:$16 sps:$4 sm:$0xff]  }
  0xaf   :  { %811 = vmatprep.subr.bf16.mxu0 %v2439_v23  ;;  %854 = vmatprep.subr.bf16.mxu1 %v2442_v24  ;;  %v2533_v23 = vld [vmem:[#allocation11 + $0x188] ss:$16 sps:$4 sm:$0xff]   ;;  %v2538_v24 = vld [vmem:[#allocation11 + $0x1a4] ss:$16 sps:$4 sm:$0xff]  }
  0xb2   :  { %812 = vmatpush1.bf16.msra.mxu0 %v2437_v25  ;;  %855 = vmatpush1.bf16.msra.mxu1 %v2440_v26  ;;  %v2541_v25 = vld [vmem:[#allocation11 + $0x1ac] ss:$16 sps:$4 sm:$0xff]   ;;  %v2536_v26 = vld [vmem:[#allocation11 + $0x1a0] ss:$16 sps:$4 sm:$0xff]  }
  0xb3   :  { %813 = vmatprep.subr.bf16.mxu0 %v2445_v27  ;;  %856 = vmatprep.subr.bf16.mxu1 %v2448_v28  ;;  %v2539_v27 = vld [vmem:[#allocation11 + $0x1a8] ss:$16 sps:$4 sm:$0xff]   ;;  %v2544_v28 = vld [vmem:[#allocation11 + $0x1c4] ss:$16 sps:$4 sm:$0xff]  }
  0xb6   :  { %814 = vmatpush1.bf16.msra.mxu0 %v2443_v29  ;;  %857 = vmatpush1.bf16.msra.mxu1 %v2446_v30  ;;  %v2547_v29 = vld [vmem:[#allocation11 + $0x1cc] ss:$16 sps:$4 sm:$0xff]   ;;  %v2542_v30 = vld [vmem:[#allocation11 + $0x1c0] ss:$16 sps:$4 sm:$0xff]  }
  0xb7   :  { %815 = vmatprep.subr.bf16.mxu0 %v2451_v31  ;;  %858 = vmatprep.subr.bf16.mxu1 %v2454_v32  ;;  %v2545_v31 = vld [vmem:[#allocation11 + $0x1c8] ss:$16 sps:$4 sm:$0xff]   ;;  %v2550_v32 = vld [vmem:[#allocation11 + $0x1e4] ss:$16 sps:$4 sm:$0xff]  }
  0xba   :  { %816 = vmatpush1.bf16.msra.mxu0 %v2449_v33  ;;  %859 = vmatpush1.bf16.msra.mxu1 %v2452_v34  ;;  %v2553_v33 = vld [vmem:[#allocation11 + $0x1ec] ss:$16 sps:$4 sm:$0xff]   ;;  %v2548_v34 = vld [vmem:[#allocation11 + $0x1e0] ss:$16 sps:$4 sm:$0xff]  }
  0xbb   :  { %1711 = vmatprep.subr.bf16.mxu0 %v2460_v35  ;;  %1797 = vmatprep.subr.bf16.mxu1 %v2463_v36  ;;  %v2551_v35 = vld [vmem:[#allocation11 + $0x1e8] ss:$16 sps:$4 sm:$0xff]   ;;  %v2556_v36 = vld [vmem:[#allocation11 + $0x204] ss:$16 sps:$4 sm:$0xff]  }
  0xbd   :  { %818 = vmatmul.mubr.bf16.vlgmr.msra.gmra.mrb[0].mxu0 %v2455_v37  ;;  %861 = vmatmul.mubr.bf16.vlgmr.msra.gmra.mrb[0].mxu1 %v2455_v37  ;;  %v2559_v37 = vld [vmem:[#allocation11 + $0x20c] ss:$16 sps:$4 sm:$0xff]  }
  0xbe   :  { %1712 = vmatpush1.bf16.msra.mxu0 %v2458_v38  ;;  %1798 = vmatpush1.bf16.msra.mxu1 %v2461_v39  ;;  %v873_v38 = vlaneseq }
  0xbf   :  { %1713 = vmatprep.subr.bf16.mxu0 %v2466_v40  ;;  %1799 = vmatprep.subr.bf16.mxu1 %v2469_v41 }
  0xc0   :  { %v2927_v39 = vshrl.u32 %v873_v38, 7  ;;  %v2581_v38 = vld [vmem:[#allocation11 + $0x288] ss:$16 sps:$4 sm:$0xff]  }
  0xc2   :  { %1714 = vmatpush1.bf16.msra.mxu0 %v2464_v42  ;;  %1800 = vmatpush1.bf16.msra.mxu1 %v2467_v43  ;;  %v875_v40 = vsub.s32 0, %v2927_v39  ;;  %v883_v41 = vsub.s32 2, %v2927_v39  ;;  %v871_v42 = vld [vmem:[%s2982_s4] sm:$0xf]  ;;  %v879_v43 = vsub.s32 1, %v2927_v39 }
  0xc3   :  { %1715 = vmatprep.subr.bf16.mxu0 %v2472_v44  ;;  %1801 = vmatprep.subr.bf16.mxu1 %v2475_v45  ;;  %v887_v44 = vsub.s32 3, %v2927_v39 }
  0xc4   :  { %v876_v45 = vrot.slane %v871_v42, %v875_v40 }
  0xc6   :  { %1716 = vmatpush1.bf16.msra.mxu0 %v2470_v46  ;;  %1802 = vmatpush1.bf16.msra.mxu1 %v2473_v47  ;;  %v884_v46 = vrot.slane %v871_v42, %v883_v41  ;;  %v880_v47 = vrot.slane %v871_v42, %v879_v43 }
  0xc7   :  { %1717 = vmatprep.subr.bf16.mxu0 %v2478_v48  ;;  %1803 = vmatprep.subr.bf16.mxu1 %v2481_v49  ;;  %v888_v48 = vrot.slane %v871_v42, %v887_v44  ;;  %v2586_v42 = vld [vmem:[#allocation11 + $0x2a4] ss:$16 sps:$4 sm:$0xff]  }
  0xca   :  { %1718 = vmatpush1.bf16.msra.mxu0 %v2476_v50  ;;  %1804 = vmatpush1.bf16.msra.mxu1 %v2479_v51 }
  0xcb   :  { %1719 = vmatprep.subr.bf16.mxu0 %v2484_v52  ;;  %1805 = vmatprep.subr.bf16.mxu1 %v2487_v53 }
  0xce   :  { %1720 = vmatpush1.bf16.msra.mxu0 %v2482_v54  ;;  %1806 = vmatpush1.bf16.msra.mxu1 %v2485_v55 }
  0xcf   :  { %1721 = vmatprep.subr.bf16.mxu0 %v2490_v56  ;;  %1807 = vmatprep.subr.bf16.mxu1 %v2493_v57 }
  0xd2   :  { %1722 = vmatpush1.bf16.msra.mxu0 %v2488_v58  ;;  %1808 = vmatpush1.bf16.msra.mxu1 %v2491_v59 }
  0xd3   :  { %1723 = vmatprep.subr.bf16.mxu0 %v2496_v60  ;;  %1809 = vmatprep.subr.bf16.mxu1 %v2499_v61 }
  0xd6   :  { %1724 = vmatpush1.bf16.msra.mxu0 %v2494_v62  ;;  %1810 = vmatpush1.bf16.msra.mxu1 %v2497_v63 }
  0xd7   :  { %1725 = vmatprep.subr.bf16.mxu0 %v2502_v0  ;;  %1811 = vmatprep.subr.bf16.mxu1 %v2505_v1 }
  0xda   :  { %1726 = vmatpush1.bf16.msra.mxu0 %v2500_v2  ;;  %1812 = vmatpush1.bf16.msra.mxu1 %v2503_v3 }
  0xdb   :  { %1727 = vmatprep.subr.bf16.mxu0 %v2508_v4  ;;  %1813 = vmatprep.subr.bf16.mxu1 %v2511_v5 }
  0xde   :  { %1728 = vmatpush1.bf16.msra.mxu0 %v2506_v6  ;;  %1814 = vmatpush1.bf16.msra.mxu1 %v2509_v7 }
  0xdf   :  { %1729 = vmatprep.subr.bf16.mxu0 %v2514_v8  ;;  %1815 = vmatprep.subr.bf16.mxu1 %v2517_v9 }
  0xe2   :  { %1730 = vmatpush1.bf16.msra.mxu0 %v2512_v10  ;;  %1816 = vmatpush1.bf16.msra.mxu1 %v2515_v11 }
  0xe3   :  { %1731 = vmatprep.subr.bf16.mxu0 %v2520_v12  ;;  %1817 = vmatprep.subr.bf16.mxu1 %v2523_v13 }
  0xe6   :  { %1732 = vmatpush1.bf16.msra.mxu0 %v2518_v14  ;;  %1818 = vmatpush1.bf16.msra.mxu1 %v2521_v15 }
  0xe7   :  { %1733 = vmatprep.subr.bf16.mxu0 %v2526_v16  ;;  %1819 = vmatprep.subr.bf16.mxu1 %v2529_v17 }
  0xea   :  { %1734 = vmatpush1.bf16.msra.mxu0 %v2524_v18  ;;  %1820 = vmatpush1.bf16.msra.mxu1 %v2527_v19 }
  0xeb   :  { %1735 = vmatprep.subr.bf16.mxu0 %v2532_v20  ;;  %1821 = vmatprep.subr.bf16.mxu1 %v2535_v21  ;;  %v2554_v20 = vld [vmem:[#allocation11 + $0x200] ss:$16 sps:$4 sm:$0xff]   ;;  %v2557_v21 = vld [vmem:[#allocation11 + $0x208] ss:$16 sps:$4 sm:$0xff]  }
  0xee   :  { %1736 = vmatpush1.bf16.msra.mxu0 %v2530_v22  ;;  %1822 = vmatpush1.bf16.msra.mxu1 %v2533_v23  ;;  %v2562_v23 = vld [vmem:[#allocation11 + $0x224] ss:$16 sps:$4 sm:$0xff]  }
  0xef   :  { %1737 = vmatprep.subr.bf16.mxu0 %v2538_v24  ;;  %1823 = vmatprep.subr.bf16.mxu1 %v2541_v25  ;;  %v2565_v24 = vld [vmem:[#allocation11 + $0x22c] ss:$16 sps:$4 sm:$0xff]   ;;  %v2560_v25 = vld [vmem:[#allocation11 + $0x220] ss:$16 sps:$4 sm:$0xff]  }
  0xf2   :  { %1738 = vmatpush1.bf16.msra.mxu0 %v2536_v26  ;;  %1824 = vmatpush1.bf16.msra.mxu1 %v2539_v27  ;;  %v2563_v26 = vld [vmem:[#allocation11 + $0x228] ss:$16 sps:$4 sm:$0xff]   ;;  %v2568_v27 = vld [vmem:[#allocation11 + $0x244] ss:$16 sps:$4 sm:$0xff]  }
  0xf3   :  { %1739 = vmatprep.subr.bf16.mxu0 %v2544_v28  ;;  %1825 = vmatprep.subr.bf16.mxu1 %v2547_v29  ;;  %v2571_v28 = vld [vmem:[#allocation11 + $0x24c] ss:$16 sps:$4 sm:$0xff]   ;;  %v2566_v29 = vld [vmem:[#allocation11 + $0x240] ss:$16 sps:$4 sm:$0xff]  }
  0xf6   :  { %1740 = vmatpush1.bf16.msra.mxu0 %v2542_v30  ;;  %1826 = vmatpush1.bf16.msra.mxu1 %v2545_v31  ;;  %v2569_v30 = vld [vmem:[#allocation11 + $0x248] ss:$16 sps:$4 sm:$0xff]   ;;  %v2574_v31 = vld [vmem:[#allocation11 + $0x264] ss:$16 sps:$4 sm:$0xff]  }
  0xf7   :  { %1741 = vmatprep.subr.bf16.mxu0 %v2550_v32  ;;  %1827 = vmatprep.subr.bf16.mxu1 %v2553_v33  ;;  %v2577_v32 = vld [vmem:[#allocation11 + $0x26c] ss:$16 sps:$4 sm:$0xff]   ;;  %v2572_v33 = vld [vmem:[#allocation11 + $0x260] ss:$16 sps:$4 sm:$0xff]  }
  0xfa   :  { %1742 = vmatpush1.bf16.msra.mxu0 %v2548_v34  ;;  %1828 = vmatpush1.bf16.msra.mxu1 %v2551_v35  ;;  %v2575_v34 = vld [vmem:[#allocation11 + $0x268] ss:$16 sps:$4 sm:$0xff]   ;;  %v2580_v35 = vld [vmem:[#allocation11 + $0x284] ss:$16 sps:$4 sm:$0xff]  }
  0xfb   :  { %1754 = vmatprep.subr.bf16.mxu0 %v2556_v36  ;;  %1840 = vmatprep.subr.bf16.mxu1 %v2559_v37  ;;  %v2583_v36 = vld [vmem:[#allocation11 + $0x28c] ss:$16 sps:$4 sm:$0xff]   ;;  %v2578_v37 = vld [vmem:[#allocation11 + $0x280] ss:$16 sps:$4 sm:$0xff]  }
 0x190   :  { %v819_v49 = vpop.f32.mrb[0].mxu0  ;;  %v862_v50 = vpop.f32.mrb[0].mxu1 }
 0x191   :  { %v893_v51 = vadd.f32 %v876_v45, %v819_v49  ;;  %v895_v52 = vadd.f32 %v884_v46, %v862_v50  ;;  %v821_v53 = vpop.f32.mrb[1].mxu0  ;;  %v864_v54 = vpop.f32.mrb[1].mxu1  ;;  %v2595_v49 = vld [vmem:[#allocation11 + $0x2cc] ss:$16 sps:$4 sm:$0xff]   ;;  %v2590_v50 = vld [vmem:[#allocation11 + $0x2c0] ss:$16 sps:$4 sm:$0xff]  }
 0x192   :  { %v894_v55 = vadd.f32 %v880_v47, %v821_v53  ;;  %v896_v56 = vadd.f32 %v888_v48, %v864_v54  ;;  %v823_v57 = vpop.f32.mrb[2].mxu0  ;;  %v866_v58 = vpop.f32.mrb[2].mxu1  ;;  %v2601_v53 = vld [vmem:[#allocation11 + $0x2ec] ss:$16 sps:$4 sm:$0xff]   ;;  %v2596_v54 = vld [vmem:[#allocation11 + $0x2e0] ss:$16 sps:$4 sm:$0xff]  }
 0x193   :  { %v901_v59 = vmul.f32 0.2, %v893_v51  ;;  %v903_v60 = vmul.f32 0.2, %v895_v52  ;;  %v897_v61 = vadd.f32 %v876_v45, %v823_v57  ;;  %v899_v62 = vadd.f32 %v884_v46, %v866_v58  ;;  %v825_v63 = vpop.f32.mrb[3].mxu0  ;;  %v868_v0 = vpop.f32.mrb[3].mxu1 }
 0x194   :  { %v902_v1 = vmul.f32 0.2, %v894_v55  ;;  %v904_v2 = vmul.f32 0.2, %v896_v56  ;;  %v898_v3 = vadd.f32 %v880_v47, %v825_v63  ;;  %v900_v4 = vadd.f32 %v888_v48, %v868_v0  ;;  %v2589_v45 = vld [vmem:[#allocation11 + $0x2ac] ss:$16 sps:$4 sm:$0xff]  }
 0x195   :  { %v905_v5 = vmul.f32 0.2, %v897_v61  ;;  %v907_v6 = vmul.f32 0.2, %v899_v62  ;;  %v909_v9 = vmax.f32 %v893_v51, %v901_v59  ;;  %v911_v10 = vmax.f32 %v895_v52, %v903_v60  ;;  %v2584_v46 = vld [vmem:[#allocation11 + $0x2a0] ss:$16 sps:$4 sm:$0xff]  }
 0x196   :  { %v906_v7 = vmul.f32 0.2, %v898_v3  ;;  %v908_v8 = vmul.f32 0.2, %v900_v4  ;;  %v910_v13 = vmax.f32 %v894_v55, %v902_v1  ;;  %v912_v14 = vmax.f32 %v896_v56, %v904_v2  ;;  %v2587_v47 = vld [vmem:[#allocation11 + $0x2a8] ss:$16 sps:$4 sm:$0xff]  }
 0x197   :  { %v913_v11 = vmax.f32 %v897_v61, %v905_v5  ;;  %v915_v12 = vmax.f32 %v899_v62, %v907_v6  ;;  %v2592_v48 = vld [vmem:[#allocation11 + $0x2c4] ss:$16 sps:$4 sm:$0xff]   ;;  %v2593_v51 = vld [vmem:[#allocation11 + $0x2c8] ss:$16 sps:$4 sm:$0xff]   ;;  %v2607_v57 = vld [vmem:[#allocation11 + $0x30c] ss:$16 sps:$4 sm:$0xff]  }
 0x198   :  { %v914_v15 = vmax.f32 %v898_v3, %v906_v7  ;;  %v916_v16 = vmax.f32 %v900_v4, %v908_v8  ;;  %v2598_v52 = vld [vmem:[#allocation11 + $0x2e4] ss:$16 sps:$4 sm:$0xff]   ;;  %v2599_v55 = vld [vmem:[#allocation11 + $0x2e8] ss:$16 sps:$4 sm:$0xff]   ;;  %v2602_v58 = vld [vmem:[#allocation11 + $0x300] ss:$16 sps:$4 sm:$0xff]  }
 0x199   :  { %v917_v17 = vpack.c.bf16 %v913_v11, %v909_v9  ;;  %v2944_v18 = vpack.c.bf16 %v915_v12, %v911_v10  ;;  %v2604_v56 = vld [vmem:[#allocation11 + $0x304] ss:$16 sps:$4 sm:$0xff]   ;;  %v2605_v59 = vld [vmem:[#allocation11 + $0x308] ss:$16 sps:$4 sm:$0xff]   ;;  %v2613_v61 = vld [vmem:[#allocation11 + $0x32c] ss:$16 sps:$4 sm:$0xff]  }
 0x19a   :  { %v918_v19 = vpack.c.bf16 %v914_v15, %v910_v13  ;;  %v920_v22 = vpack.c.bf16 %v916_v16, %v912_v14  ;;  %v2610_v60 = vld [vmem:[#allocation11 + $0x324] ss:$16 sps:$4 sm:$0xff]   ;;  %v2608_v62 = vld [vmem:[#allocation11 + $0x320] ss:$16 sps:$4 sm:$0xff]   ;;  %v2611_v63 = vld [vmem:[#allocation11 + $0x328] ss:$16 sps:$4 sm:$0xff]  }
 0x19b   :  { %v2616_v0 = vld [vmem:[#allocation11 + $0x344] ss:$16 sps:$4 sm:$0xff]   ;;  %v2619_v1 = vld [vmem:[#allocation11 + $0x34c] ss:$16 sps:$4 sm:$0xff]   ;;  %v2614_v2 = vld [vmem:[#allocation11 + $0x340] ss:$16 sps:$4 sm:$0xff]  }
 0x19c   :  { %1743 = vmatprep.mubr.bf16.mxu0 %v918_v19  ;;  %1829 = vmatprep.mubr.bf16.mxu1 %v918_v19  ;;  %v2617_v3 = vld [vmem:[#allocation11 + $0x348] ss:$16 sps:$4 sm:$0xff]   ;;  %v2622_v4 = vld [vmem:[#allocation11 + $0x364] ss:$16 sps:$4 sm:$0xff]   ;;  %v2625_v5 = vld [vmem:[#allocation11 + $0x36c] ss:$16 sps:$4 sm:$0xff]  }
 0x19d   :  { %1744 = vmatmul.mubr.bf16.vlgmr.msra.gmra.mrb[4].mxu0 %v917_v17  ;;  %1830 = vmatmul.mubr.bf16.vlgmr.msra.gmra.mrb[4].mxu1 %v917_v17  ;;  %v2620_v6 = vld [vmem:[#allocation11 + $0x360] ss:$16 sps:$4 sm:$0xff]   ;;  %v2623_v7 = vld [vmem:[#allocation11 + $0x368] ss:$16 sps:$4 sm:$0xff]   ;;  %v2628_v8 = vld [vmem:[#allocation11 + $0x384] ss:$16 sps:$4 sm:$0xff]  }
 0x19e   :  { %1755 = vmatpush1.bf16.msra.mxu0 %v2554_v20  ;;  %1841 = vmatpush1.bf16.msra.mxu1 %v2557_v21  ;;  %v2631_v9 = vld [vmem:[#allocation11 + $0x38c] ss:$16 sps:$4 sm:$0xff]   ;;  %v2626_v10 = vld [vmem:[#allocation11 + $0x380] ss:$16 sps:$4 sm:$0xff]   ;;  %v2629_v11 = vld [vmem:[#allocation11 + $0x388] ss:$16 sps:$4 sm:$0xff]  }
 0x19f   :  { %1786 = vmatprep.mubr.bf16.mxu0 %v920_v22  ;;  %1872 = vmatprep.mubr.bf16.mxu1 %v920_v22  ;;  %v2634_v12 = vld [vmem:[#allocation11 + $0x3a4] ss:$16 sps:$4 sm:$0xff]   ;;  %v2637_v13 = vld [vmem:[#allocation11 + $0x3ac] ss:$16 sps:$4 sm:$0xff]   ;;  %v2632_v14 = vld [vmem:[#allocation11 + $0x3a0] ss:$16 sps:$4 sm:$0xff]  }
 0x1a0   :  { %1756 = vmatprep.subr.bf16.mxu0 %v2562_v23  ;;  %1842 = vmatprep.subr.bf16.mxu1 %v2565_v24  ;;  %v2635_v15 = vld [vmem:[#allocation11 + $0x3a8] ss:$16 sps:$4 sm:$0xff]   ;;  %v2640_v16 = vld [vmem:[#allocation11 + $0x3c4] ss:$16 sps:$4 sm:$0xff]   ;;  %v2643_v17 = vld [vmem:[#allocation11 + $0x3cc] ss:$16 sps:$4 sm:$0xff]  }
 0x1a1   :  { %v2638_v19 = vld [vmem:[#allocation11 + $0x3c0] ss:$16 sps:$4 sm:$0xff]   ;;  %v2641_v20 = vld [vmem:[#allocation11 + $0x3c8] ss:$16 sps:$4 sm:$0xff]   ;;  %v2646_v21 = vld [vmem:[#allocation11 + $0x3e4] ss:$16 sps:$4 sm:$0xff]  }
 0x1a2   :  { %1757 = vmatpush1.bf16.msra.mxu0 %v2560_v25  ;;  %1843 = vmatpush1.bf16.msra.mxu1 %v2563_v26  ;;  %v2649_v22 = vld [vmem:[#allocation11 + $0x3ec] ss:$16 sps:$4 sm:$0xff]   ;;  %v2644_v23 = vld [vmem:[#allocation11 + $0x3e0] ss:$16 sps:$4 sm:$0xff]   ;;  %v2647_v24 = vld [vmem:[#allocation11 + $0x3e8] ss:$16 sps:$4 sm:$0xff]  }
 0x1a3   :  { %1758 = vmatprep.subr.bf16.mxu0 %v2568_v27  ;;  %1844 = vmatprep.subr.bf16.mxu1 %v2571_v28  ;;  %v2806_v25 = vmov 1966171168   ;;  %v2268_v28 = vld.sshfl [vmem:[%s2985_s7] sm:$0x33 pattern:$0x75316420] }
 0x1a4   :  { %v1916_v26 = vunpack.c.l.s4 %v2806_v25 }
 0x1a6   :  { %1759 = vmatpush1.bf16.msra.mxu0 %v2566_v29  ;;  %1845 = vmatpush1.bf16.msra.mxu1 %v2569_v30  ;;  %v1917_v27 = vunpack.c.0.s8 %v1916_v26  ;;  %v1914_v29 = vcombine.high %v2268_v28, %v2268_v28 }
 0x1a7   :  { %1760 = vmatprep.subr.bf16.mxu0 %v2574_v31  ;;  %1846 = vmatprep.subr.bf16.mxu1 %v2577_v32 }
 0x1a8   :  { %v1920_v30 = vsub.s32 %v1917_v27, %v2927_v39 }
 0x1aa   :  { %1761 = vmatpush1.bf16.msra.mxu0 %v2572_v33  ;;  %1847 = vmatpush1.bf16.msra.mxu1 %v2575_v34  ;;  %v1928_v31 = vrot.slane %v1914_v29, %v1920_v30  ;;  %v1921_v32 = vrot.slane %v2268_v28, %v1920_v30  ;;  %v1049_v34 = vld [vmem:[%s2984_s6] sm:$0xf] }
 0x1ab   :  { %1762 = vmatprep.subr.bf16.mxu0 %v2580_v35  ;;  %1848 = vmatprep.subr.bf16.mxu1 %v2583_v36  ;;  %v1062_v35 = vrot.slane %v1049_v34, %v883_v41  ;;  %v1058_v36 = vrot.slane %v1049_v34, %v879_v43 }
 0x1ac   :  { %v1930_v33 = vcombine.high %v1928_v31, %v1928_v31 }
 0x1ae   :  { %1763 = vmatpush1.bf16.msra.mxu0 %v2578_v37  ;;  %1849 = vmatpush1.bf16.msra.mxu1 %v2581_v38  ;;  %v1066_v37 = vrot.slane %v1049_v34, %v887_v44 }
 0x1af   :  { %1764 = vmatprep.subr.bf16.mxu0 %v2586_v42  ;;  %1850 = vmatprep.subr.bf16.mxu1 %v2589_v45 }
 0x1b2   :  { %1765 = vmatpush1.bf16.msra.mxu0 %v2584_v46  ;;  %1851 = vmatpush1.bf16.msra.mxu1 %v2587_v47 }
 0x1b3   :  { %1766 = vmatprep.subr.bf16.mxu0 %v2592_v48  ;;  %1852 = vmatprep.subr.bf16.mxu1 %v2595_v49 }
 0x1b6   :  { %1767 = vmatpush1.bf16.msra.mxu0 %v2590_v50  ;;  %1853 = vmatpush1.bf16.msra.mxu1 %v2593_v51 }
 0x1b7   :  { %1768 = vmatprep.subr.bf16.mxu0 %v2598_v52  ;;  %1854 = vmatprep.subr.bf16.mxu1 %v2601_v53 }
 0x1ba   :  { %1769 = vmatpush1.bf16.msra.mxu0 %v2596_v54  ;;  %1855 = vmatpush1.bf16.msra.mxu1 %v2599_v55 }
 0x1bb   :  { %1770 = vmatprep.subr.bf16.mxu0 %v2604_v56  ;;  %1856 = vmatprep.subr.bf16.mxu1 %v2607_v57 }
 0x1be   :  { %1771 = vmatpush1.bf16.msra.mxu0 %v2602_v58  ;;  %1857 = vmatpush1.bf16.msra.mxu1 %v2605_v59 }
 0x1bf   :  { %1772 = vmatprep.subr.bf16.mxu0 %v2610_v60  ;;  %1858 = vmatprep.subr.bf16.mxu1 %v2613_v61 }
 0x1c2   :  { %1773 = vmatpush1.bf16.msra.mxu0 %v2608_v62  ;;  %1859 = vmatpush1.bf16.msra.mxu1 %v2611_v63 }
 0x1c3   :  { %1774 = vmatprep.subr.bf16.mxu0 %v2616_v0  ;;  %1860 = vmatprep.subr.bf16.mxu1 %v2619_v1 }
 0x1c6   :  { %1775 = vmatpush1.bf16.msra.mxu0 %v2614_v2  ;;  %1861 = vmatpush1.bf16.msra.mxu1 %v2617_v3 }
 0x1c7   :  { %1776 = vmatprep.subr.bf16.mxu0 %v2622_v4  ;;  %1862 = vmatprep.subr.bf16.mxu1 %v2625_v5 }
 0x1ca   :  { %1777 = vmatpush1.bf16.msra.mxu0 %v2620_v6  ;;  %1863 = vmatpush1.bf16.msra.mxu1 %v2623_v7 }
 0x1cb   :  { %1778 = vmatprep.subr.bf16.mxu0 %v2628_v8  ;;  %1864 = vmatprep.subr.bf16.mxu1 %v2631_v9 }
 0x1ce   :  { %1779 = vmatpush1.bf16.msra.mxu0 %v2626_v10  ;;  %1865 = vmatpush1.bf16.msra.mxu1 %v2629_v11  ;;  %v1929_v10 = vcombine.high %v1921_v32, %v1921_v32  ;;  %v1905_v11 = vstv %s2986_s8  ;;  %s2764_s8 = scalar_lea.vmem %s2031_s13, 16 }
 0x1cf   :  { %1780 = vmatprep.subr.bf16.mxu0 %v2634_v12  ;;  %1866 = vmatprep.subr.bf16.mxu1 %v2637_v13  ;;  %p2765_p12 = scmp.ne.s32.totalorder %s2031_s13, %s2764_s8  ;;  %p2770_p0 = scmp.lt.s32.totalorder %s2768_s1, %s2764_s8 }
 0x1d1   :  { %p2771_p1 = por %p2770_p0, %p2769_p13 }
 0x1d2   :  { %1781 = vmatpush1.bf16.msra.mxu0 %v2632_v14  ;;  %1867 = vmatpush1.bf16.msra.mxu1 %v2635_v15 }
 0x1d3   :  { %1782 = vmatprep.subr.bf16.mxu0 %v2640_v16  ;;  %1868 = vmatprep.subr.bf16.mxu1 %v2643_v17  ;;  %p2772_p2 = pnand %p2771_p1, %p2765_p12 }
 0x1d6   :  { %1783 = vmatpush1.bf16.msra.mxu0 %v2638_v19  ;;  %1869 = vmatpush1.bf16.msra.mxu1 %v2641_v20 }
 0x1d7   :  { %1784 = vmatprep.subr.bf16.mxu0 %v2646_v21  ;;  %1870 = vmatprep.subr.bf16.mxu1 %v2649_v22 }
 0x1da   :  { %1785 = vmatpush1.bf16.msra.mxu0 %v2644_v23  ;;  %1871 = vmatpush1.bf16.msra.mxu1 %v2647_v24 }
 0x1dd   :  { %1787 = vmatmul.mubr.bf16.vlgmr.msra.gmra.mrb[4].mxu0 %v2944_v18  ;;  %1873 = vmatmul.mubr.bf16.vlgmr.msra.gmra.mrb[4].mxu1 %v2944_v18  ;;  %v1054_v18 = vrot.slane %v1049_v34, %v875_v40 }
 0x1de   :  { %1967 = vmatprep.mubr.bf16.mxu1 %v1928_v31  ;;  %2007 = vmatprep.mubr.bf16.mxu0 %v1930_v33 }
 0x2b0   :  { %v1788_v38 = vpop.f32.mrb[4].mxu0  ;;  %v1874_v42 = vpop.f32.mrb[4].mxu1 }
 0x2b1   :  { %v2270_v45 = vadd.f32 %v1788_v38, %v1054_v18  ;;  %v2274_v46 = vadd.f32 %v1874_v42, %v1062_v35  ;;  %v1790_v47 = vpop.f32.mrb[5].mxu0  ;;  %v1876_v48 = vpop.f32.mrb[5].mxu1 }
 0x2b2   :  { %v2271_v49 = vadd.f32 %v1790_v47, %v1058_v36  ;;  %v2275_v50 = vadd.f32 %v1876_v48, %v1066_v37  ;;  %v1792_v51 = vpop.f32.mrb[6].mxu0  ;;  %v1878_v52 = vpop.f32.mrb[6].mxu1 }
 0x2b3   :  { %v1883_v40 = vmul.f32 0.2, %v2270_v45  ;;  %v1885_v53 = vmul.f32 0.2, %v2274_v46  ;;  %v2272_v54 = vadd.f32 %v1792_v51, %v1054_v18  ;;  %v2276_v41 = vadd.f32 %v1878_v52, %v1062_v35  ;;  %v1794_v55 = vpop.f32.mrb[7].mxu0  ;;  %v1880_v56 = vpop.f32.mrb[7].mxu1 }
 0x2b4   :  { %v1884_v43 = vmul.f32 0.2, %v2271_v49  ;;  %v1886_v57 = vmul.f32 0.2, %v2275_v50  ;;  %v2273_v39 = vadd.f32 %v1794_v55, %v1058_v36  ;;  %v2277_v44 = vadd.f32 %v1880_v56, %v1066_v37 }
 0x2b5   :  { %v1887_v58 = vmul.f32 0.2, %v2272_v54  ;;  %v1889_v59 = vmul.f32 0.2, %v2276_v41  ;;  %v1891_v62 = vmax.f32 %v2270_v45, %v1883_v40  ;;  %v1893_v63 = vmax.f32 %v2274_v46, %v1885_v53 }
 0x2b6   :  { %v1888_v60 = vmul.f32 0.2, %v2273_v39  ;;  %v1890_v61 = vmul.f32 0.2, %v2277_v44  ;;  %v1892_v2 = vmax.f32 %v2271_v49, %v1884_v43  ;;  %v1894_v3 = vmax.f32 %v2275_v50, %v1886_v57 }
 0x2b7   :  { %v1895_v0 = vmax.f32 %v2272_v54, %v1887_v58  ;;  %v1897_v1 = vmax.f32 %v2276_v41, %v1889_v59 }
 0x2b8   :  { %v1896_v4 = vmax.f32 %v2273_v39, %v1888_v60  ;;  %v1898_v5 = vmax.f32 %v2277_v44, %v1890_v61 }
 0x2b9   :  { %v1900_v6 = vpack.c.bf16 %v1895_v0, %v1891_v62  ;;  %v1902_v7 = vpack.c.bf16 %v1897_v1, %v1893_v63 }
 0x2ba   :  { %v1901_v8 = vpack.c.bf16 %v1896_v4, %v1892_v2  ;;  %v1903_v9 = vpack.c.bf16 %v1898_v5, %v1894_v3 }
 0x2bc   :  { %1935 = vmatprep.subr.bf16.mxu1 %v1901_v8  ;;  %1975 = vmatprep.subr.bf16.mxu0 %v1903_v9 }
 0x2bd   :  { %1936 = vmatpush1.bf16.xpose.msra.mxu1 %v1900_v6  ;;  %1976 = vmatpush1.bf16.xpose.msra.mxu0 %v1902_v7 }
 0x2c4   :  { %1968 = vmatmul.mubr.bf16.vlgmr.msra.gmra.mrb[8].mxu1 %v1921_v32  ;;  %2008 = vmatmul.mubr.bf16.vlgmr.msra.gmra.mrb[8].mxu0 %v1929_v10 }
 0x397   :  { %v1969_v12 = vpop.f32.mrb[8].mxu1  ;;  %v2009_v13 = vpop.f32.mrb[8].mxu0 }
 0x398   :  { %v1970_v14 = vadd.f32 %v1969_v12, %v1905_v11  ;;  %v1971_v15 = vpop.f32.mrb[9].mxu1  ;;  %v2011_v16 = vpop.f32.mrb[9].mxu0 }
 0x399   :  { %v1972_v17 = vpop.f32.mrb[10].mxu1  ;;  %v2012_v19 = vpop.f32.mrb[10].mxu0 }
 0x39a   :  { %v2010_v20 = vadd.f32 %v2009_v13, %v1970_v14  ;;  %v1973_v21 = vpop.f32.mrb[11].mxu1  ;;  %v2013_v22 = vpop.f32.mrb[11].mxu0 }
 0x39c   :  { %v2269_v23 = vclamps-f32 %v2010_v20, 30.0 }
 0x39e   :  { %v2017_v24 = vsub.f32 0.0, %v2269_v23 }
 0x3a0   :  { %v2018_v25 = vmul.f32 1.442695, %v2017_v24 }
 0x3a2   :  { %2650 = vpow2.f32 %v2018_v25 }
 0x3ac   :  { %v2651_v26 = vpop.eup %2650 }
 0x3ad   :  { %v2020_v27 = vadd.f32 1.0, %v2651_v26 }
 0x3af   :  { %2652 = vrcp.f32 %v2020_v27 }
 0x3b9   :  { %v2653_v28 = vpop.eup %2652 }
 0x3ba   :  { %2023 = vst.msk [vmem:[#allocation12] sm:$0x1] %vm2022_vm0, %v2653_v28 }
 0x3bb   :  { %2775 = shalt.err (!%p2772_p2)
}
 0x3bc   :  { %s2776_s17 = scalar_lea.hbm %s2987_s9, 16 }
 0x3bd   :  { %p2777_p3 = scmp.ne.s32.totalorder %s2987_s9, %s2776_s17  ;;  %p2780_p4 = scmp.lt.u32.totalorder %s2776_s17, %s2987_s9 }
 0x3bf   :  { %p2782_p5 = pnand %p2780_p4, %p2777_p3 }
 0x3c1   :  { %2785 = shalt.err (!%p2782_p5)
}
 0x3c2   :  { %2033 = dma.vmem_to_hbm [thread:$0]  %s2031_s13, 16, %s2987_s9, [#allocation5]  }
 0x3c3   :  { %2792 = dma.done.wait [#allocation5], 16  }
 0x3c4   :  { %2793 = vsyncadd [#allocation5], 4294967280 }
 0x3c5   :  { %2037 = vsyncpa [#allocation4], 1 }
 0x3c6   :  { %2038 = vsyncpa [#allocation7], 1 }
 0x3c7   :  { %2039 = vsyncpa [#allocation10], 1 }
 0x3c8   :  { %2040 = vsyncpa [#allocation5], 1 }

// kernel: tpu_custom_call.1
= control target key start
LH: loop header
LB: loop body
LE: loop exit
PB: predicated region body
PF: predicated region fallthrough
CT: control target
= control target key end

     0   :  { %15 = vsyncpa [#allocation4], 0  ;;  %s2978_s0 = inlined_call_operand.hbm [shape: bf16[16,256], index: 0, kind: input, shape index: {}]   ;;  %s2979_s1 = inlined_call_operand.hbm [shape: bf16[16,128], index: 1, kind: input, shape index: {}]   ;;  %s2980_s2 = inlined_call_operand.hbm [shape: bf16[256,512], index: 2, kind: input, shape index: {}]   ;;  %s2981_s3 = inlined_call_operand.hbm [shape: bf16[128,512], index: 3, kind: input, shape index: {}]   ;;  %s2982_s4 = inlined_call_operand.vmem [shape: f32[1,512], index: 4, kind: input, shape index: {}]   ;;  %s2983_s5 = inlined_call_operand.hbm [shape: bf16[512,512], index: 5, kind: input, shape index: {}]   ;;  %s2984_s6 = inlined_call_operand.vmem [shape: f32[1,512], index: 6, kind: input, shape index: {}]   ;;  %s2985_s7 = inlined_call_operand.vmem [shape: bf16[1,512], index: 7, kind: input, shape index: {}]   ;;  %s2986_s8 = inlined_call_operand.<no memory space> [shape: f32[1,1], index: 8, kind: input, shape index: {}]   ;;  %s2987_s9 = inlined_call_operand.hbm [shape: f32[1,1,16], index: 9, kind: output, shape index: {}]  }
   0x1   :  { %16 = vsyncpa [#allocation7], 0 }
   0x2   :  { %17 = vsyncpa [#allocation10], 0 }
   0x3   :  { %18 = vsyncpa [#allocation5], 0  ;;  %s2794_s30 = smov [#allocation6]   ;;  %s2654_s13 = scalar_lea.hbm %s2979_s1, 128 }
   0x4   :  { %s36_s10 = sshll.u32 %s2794_s30, 4  ;;  %p2655_p0 = scmp.ne.s32.totalorder %s2979_s1, %s2654_s13  ;;  %s37_s10 = int_to_ptr.vmem [resolvable:$true] %s36_s10 }
   0x5   :  { %p2658_p1 = scmp.lt.u32.totalorder %s2654_s13, %s2979_s1 }
   0x7   :  { %p2660_p2 = pnand %p2658_p1, %p2655_p0 }
   0x9   :  { %2663 = shalt.err (!%p2660_p2)
}
   0xa   :  { %s2664_s18 = scalar_lea.vmem %s37_s10, 128  ;;  %p2669_p4 = scmp.lt.s32.totalorder %s37_s10, %s37_s10 }
   0xb   :  { %p2665_p3 = scmp.ne.s32.totalorder %s37_s10, %s2664_s18  ;;  %p2670_p5 = scmp.lt.s32.totalorder %s2664_s18, %s2664_s18 }
   0xd   :  { %p2671_p6 = por %p2670_p5, %p2669_p4 }
   0xf   :  { %p2672_p7 = pnand %p2671_p6, %p2665_p3 }
  0x11   :  { %2675 = shalt.err (!%p2672_p7)
}
  0x12   :  { %s2795_s19 = smov 64   ;;  %s2796_s20 = smov 4  }
  0x13   :  { %42 = dma.hbm_to_vmem [thread:$0]  %s2979_s1, 128, %s37_s10, [#allocation7], %s2795_s19, %s2795_s19, %s2796_s20  }
  0x14   :  { %s2797_s23 = smov [#allocation9]   ;;  %s2798_s25 = smov [#allocation3]  }
  0x15   :  { %s60_s24 = sshll.u32 %s2797_s23, 4  ;;  %s24_s26 = sshll.u32 %s2798_s25, 4  ;;  %s61_s24 = int_to_ptr.vmem [resolvable:$true] %s60_s24  ;;  %s25_s26 = int_to_ptr.vmem [resolvable:$true] %s24_s26 }
  0x16   :  { %s2676_s29 = scalar_lea.hbm %s2981_s3, 4096 }
  0x17   :  { %p2677_p8 = scmp.ne.s32.totalorder %s2981_s3, %s2676_s29  ;;  %p2680_p9 = scmp.lt.u32.totalorder %s2676_s29, %s2981_s3 }
  0x19   :  { %p2682_p10 = pnand %p2680_p9, %p2677_p8 }
  0x1b   :  { %2685 = shalt.err (!%p2682_p10)
}
  0x1c   :  { %s2686_s1 = scalar_lea.vmem %s61_s24, 4096  ;;  %p2691_p12 = scmp.lt.s32.totalorder %s61_s24, %s61_s24 }
  0x1d   :  { %p2687_p11 = scmp.ne.s32.totalorder %s61_s24, %s2686_s1  ;;  %p2692_p13 = scmp.lt.s32.totalorder %s2686_s1, %s2686_s1 }
  0x1f   :  { %p2693_p0 = por %p2692_p13, %p2691_p12 }
  0x21   :  { %p2694_p1 = pnand %p2693_p0, %p2687_p11 }
  0x23   :  { %2697 = shalt.err (!%p2694_p1)
}
  0x24   :  { %s2799_s10 = smov 256   ;;  %s2800_s14 = smov 16  }
  0x25   :  { %66 = dma.hbm_to_vmem [thread:$0]  %s2981_s3, 4096, %s61_s24, [#allocation10], %s2799_s10, %s2799_s10, %s2800_s14  }
  0x26   :  { %s2698_s19 = scalar_lea.hbm %s2978_s0, 256 }
  0x27   :  { %p2699_p2 = scmp.ne.s32.totalorder %s2978_s0, %s2698_s19  ;;  %p2702_p3 = scmp.lt.u32.totalorder %s2698_s19, %s2978_s0 }
  0x29   :  { %p2704_p4 = pnand %p2702_p3, %p2699_p2 }
  0x2b   :  { %2707 = shalt.err (!%p2704_p4)
}
  0x2c   :  { %s2708_s25 = scalar_lea.vmem %s25_s26, 256  ;;  %p2713_p6 = scmp.lt.s32.totalorder %s25_s26, %s25_s26 }
  0x2d   :  { %p2709_p5 = scmp.ne.s32.totalorder %s25_s26, %s2708_s25  ;;  %p2714_p7 = scmp.lt.s32.totalorder %s2708_s25, %s2708_s25 }
  0x2f   :  { %p2715_p8 = por %p2714_p7, %p2713_p6 }
  0x31   :  { %p2716_p9 = pnand %p2715_p8, %p2709_p5 }
  0x33   :  { %2719 = shalt.err (!%p2716_p9)
}
  0x34   :  { %s2801_s3 = smov 128   ;;  %s2802_s24 = smov 8  }
  0x35   :  { %30 = dma.hbm_to_vmem [thread:$0]  %s2978_s0, 256, %s25_s26, [#allocation4], %s2801_s3, %s2801_s3, %s2802_s24  }
  0x36   :  { %s2803_s29 = smov [#allocation8]   ;;  %s2804_s11 = smov [#allocation11]  }
  0x37   :  { %s48_s30 = sshll.u32 %s2803_s29, 4  ;;  %s74_s12 = sshll.u32 %s2804_s11, 4  ;;  %s49_s30 = int_to_ptr.vmem [resolvable:$true] %s48_s30  ;;  %s75_s12 = int_to_ptr.vmem [resolvable:$true] %s74_s12 }
  0x38   :  { %s2720_s15 = scalar_lea.hbm %s2980_s2, 8192 }
  0x39   :  { %p2721_p10 = scmp.ne.s32.totalorder %s2980_s2, %s2720_s15  ;;  %p2724_p11 = scmp.lt.u32.totalorder %s2720_s15, %s2980_s2 }
  0x3b   :  { %p2726_p12 = pnand %p2724_p11, %p2721_p10 }
  0x3d   :  { %2729 = shalt.err (!%p2726_p12)
}
  0x3e   :  { %s2730_s0 = scalar_lea.vmem %s49_s30, 8192  ;;  %p2735_p0 = scmp.lt.s32.totalorder %s49_s30, %s49_s30 }
  0x3f   :  { %p2731_p13 = scmp.ne.s32.totalorder %s49_s30, %s2730_s0  ;;  %p2736_p1 = scmp.lt.s32.totalorder %s2730_s0, %s2730_s0 }
  0x41   :  { %p2737_p2 = por %p2736_p1, %p2735_p0 }
  0x43   :  { %p2738_p3 = pnand %p2737_p2, %p2731_p13 }
  0x45   :  { %2741 = shalt.err (!%p2738_p3)
}
  0x46   :  { %54 = dma.hbm_to_vmem [thread:$0]  %s2980_s2, 8192, %s49_s30, [#allocation7], %s2799_s10, %s2799_s10, %s2800_s14  }
  0x47   :  { %s2742_s23 = scalar_lea.hbm %s2983_s5, 16384 }
  0x48   :  { %p2743_p4 = scmp.ne.s32.totalorder %s2983_s5, %s2742_s23  ;;  %p2746_p5 = scmp.lt.u32.totalorder %s2742_s23, %s2983_s5 }
  0x4a   :  { %p2748_p6 = pnand %p2746_p5, %p2743_p4 }
  0x4c   :  { %2751 = shalt.err (!%p2748_p6)
}
  0x4d   :  { %s2752_s28 = scalar_lea.vmem %s75_s12, 16384  ;;  %p2757_p8 = scmp.lt.s32.totalorder %s75_s12, %s75_s12 }
  0x4e   :  { %p2753_p7 = scmp.ne.s32.totalorder %s75_s12, %s2752_s28  ;;  %p2758_p9 = scmp.lt.s32.totalorder %s2752_s28, %s2752_s28 }
  0x50   :  { %p2759_p10 = por %p2758_p9, %p2757_p8 }
  0x52   :  { %p2760_p11 = pnand %p2759_p10, %p2753_p7 }
  0x54   :  { %2763 = shalt.err (!%p2760_p11)
}
  0x55   :  { %80 = dma.hbm_to_vmem [thread:$0]  %s2983_s5, 16384, %s75_s12, [#allocation10], %s2799_s10, %s2799_s10, %s2800_s14  }
  0x56   :  { %2786 = dma.done.wait [#allocation4], 256  }
  0x57   :  { %2787 = vsyncadd [#allocation4], 4294967040 }
  0x58   :  { %2788 = dma.done.wait [#allocation7], 8320  }
  0x59   :  { %2789 = vsyncadd [#allocation7], 4294958976 }
  0x5a   :  { %2790 = dma.done.wait [#allocation10], 20480  }
  0x5b   :  { %2791 = vsyncadd [#allocation10], 4294946816  ;;  %v2805_v0 = vmov 0   ;;  %v2310_v1 = vld [vmem:[#allocation9 + $0x4] ss:$16 sps:$4 sm:$0xff]   ;;  %v2364_v36 = vld [vmem:[#allocation6] sm:$0xff]  }
  0x5c   :  { %401 = vmatprep.mubr.bf16.mxu0 %v2805_v0  ;;  %444 = vmatprep.mubr.bf16.mxu1 %v2805_v0  ;;  %v2312_v2 = vld [vmem:[#allocation9 + $0xc] ss:$16 sps:$4 sm:$0xff]   ;;  %v2314_v3 = vld [vmem:[#allocation9] ss:$16 sps:$4 sm:$0xff]   ;;  %v2315_v4 = vld [vmem:[#allocation9 + $0x8] ss:$16 sps:$4 sm:$0xff]  }
  0x5d   :  { %369 = vmatprep.subr.bf16.mxu0 %v2310_v1  ;;  %412 = vmatprep.subr.bf16.mxu1 %v2312_v2  ;;  %v2316_v5 = vld [vmem:[#allocation9 + $0x24] ss:$16 sps:$4 sm:$0xff]   ;;  %v2318_v6 = vld [vmem:[#allocation9 + $0x2c] ss:$16 sps:$4 sm:$0xff]   ;;  %v2320_v7 = vld [vmem:[#allocation9 + $0x20] ss:$16 sps:$4 sm:$0xff]  }
  0x5e   :  { %370 = vmatpush1.bf16.msra.mxu0 %v2314_v3  ;;  %413 = vmatpush1.bf16.msra.mxu1 %v2315_v4  ;;  %v2321_v8 = vld [vmem:[#allocation9 + $0x28] ss:$16 sps:$4 sm:$0xff]   ;;  %v2322_v9 = vld [vmem:[#allocation9 + $0x44] ss:$16 sps:$4 sm:$0xff]   ;;  %v2324_v10 = vld [vmem:[#allocation9 + $0x4c] ss:$16 sps:$4 sm:$0xff]  }
  0x5f   :  { %371 = vmatprep.subr.bf16.mxu0 %v2316_v5  ;;  %414 = vmatprep.subr.bf16.mxu1 %v2318_v6  ;;  %v2326_v11 = vld [vmem:[#allocation9 + $0x40] ss:$16 sps:$4 sm:$0xff]   ;;  %v2327_v12 = vld [vmem:[#allocation9 + $0x48] ss:$16 sps:$4 sm:$0xff]   ;;  %v2328_v13 = vld [vmem:[#allocation9 + $0x64] ss:$16 sps:$4 sm:$0xff]  }
  0x60   :  { %v2330_v14 = vld [vmem:[#allocation9 + $0x6c] ss:$16 sps:$4 sm:$0xff]   ;;  %v2332_v15 = vld [vmem:[#allocation9 + $0x60] ss:$16 sps:$4 sm:$0xff]   ;;  %v2333_v16 = vld [vmem:[#allocation9 + $0x68] ss:$16 sps:$4 sm:$0xff]  }
  0x61   :  { %v2334_v17 = vld [vmem:[#allocation9 + $0x84] ss:$16 sps:$4 sm:$0xff]   ;;  %v2336_v18 = vld [vmem:[#allocation9 + $0x8c] ss:$16 sps:$4 sm:$0xff]   ;;  %v2338_v19 = vld [vmem:[#allocation9 + $0x80] ss:$16 sps:$4 sm:$0xff]  }
  0x62   :  { %372 = vmatpush1.bf16.msra.mxu0 %v2320_v7  ;;  %415 = vmatpush1.bf16.msra.mxu1 %v2321_v8  ;;  %v2339_v20 = vld [vmem:[#allocation9 + $0x88] ss:$16 sps:$4 sm:$0xff]   ;;  %v2340_v21 = vld [vmem:[#allocation9 + $0xa4] ss:$16 sps:$4 sm:$0xff]   ;;  %v2342_v22 = vld [vmem:[#allocation9 + $0xac] ss:$16 sps:$4 sm:$0xff]  }
  0x63   :  { %373 = vmatprep.subr.bf16.mxu0 %v2322_v9  ;;  %416 = vmatprep.subr.bf16.mxu1 %v2324_v10  ;;  %v2344_v23 = vld [vmem:[#allocation9 + $0xa0] ss:$16 sps:$4 sm:$0xff]   ;;  %v2345_v24 = vld [vmem:[#allocation9 + $0xa8] ss:$16 sps:$4 sm:$0xff]   ;;  %v2346_v25 = vld [vmem:[#allocation9 + $0xc4] ss:$16 sps:$4 sm:$0xff]  }
  0x64   :  { %v2348_v26 = vld [vmem:[#allocation9 + $0xcc] ss:$16 sps:$4 sm:$0xff]   ;;  %v2350_v27 = vld [vmem:[#allocation9 + $0xc0] ss:$16 sps:$4 sm:$0xff]   ;;  %v2351_v28 = vld [vmem:[#allocation9 + $0xc8] ss:$16 sps:$4 sm:$0xff]  }
  0x65   :  { %v2352_v29 = vld [vmem:[#allocation9 + $0xe4] ss:$16 sps:$4 sm:$0xff]   ;;  %v2354_v30 = vld [vmem:[#allocation9 + $0xec] ss:$16 sps:$4 sm:$0xff]   ;;  %v2356_v31 = vld [vmem:[#allocation9 + $0xe0] ss:$16 sps:$4 sm:$0xff]  }
  0x66   :  { %374 = vmatpush1.bf16.msra.mxu0 %v2326_v11  ;;  %417 = vmatpush1.bf16.msra.mxu1 %v2327_v12  ;;  %v2357_v32 = vld [vmem:[#allocation9 + $0xe8] ss:$16 sps:$4 sm:$0xff]   ;;  %v2360_v33 = vld [vmem:[#allocation8 + $0x4] ss:$16 sps:$4 sm:$0xff]   ;;  %v2363_v34 = vld [vmem:[#allocation8 + $0xc] ss:$16 sps:$4 sm:$0xff]  }
  0x67   :  { %375 = vmatprep.subr.bf16.mxu0 %v2328_v13  ;;  %418 = vmatprep.subr.bf16.mxu1 %v2330_v14  ;;  %v2358_v35 = vld [vmem:[#allocation8] ss:$16 sps:$4 sm:$0xff]   ;;  %v2361_v37 = vld [vmem:[#allocation8 + $0x8] ss:$16 sps:$4 sm:$0xff]   ;;  %v2367_v38 = vld [vmem:[#allocation8 + $0x24] ss:$16 sps:$4 sm:$0xff]  }
  0x68   :  { %v2370_v39 = vld [vmem:[#allocation8 + $0x2c] ss:$16 sps:$4 sm:$0xff]   ;;  %v2365_v40 = vld [vmem:[#allocation8 + $0x20] ss:$16 sps:$4 sm:$0xff]   ;;  %v2368_v41 = vld [vmem:[#allocation8 + $0x28] ss:$16 sps:$4 sm:$0xff]  }
  0x69   :  { %v2373_v42 = vld [vmem:[#allocation8 + $0x44] ss:$16 sps:$4 sm:$0xff]   ;;  %v2376_v43 = vld [vmem:[#allocation8 + $0x4c] ss:$16 sps:$4 sm:$0xff]   ;;  %v2371_v44 = vld [vmem:[#allocation8 + $0x40] ss:$16 sps:$4 sm:$0xff]  }
  0x6a   :  { %376 = vmatpush1.bf16.msra.mxu0 %v2332_v15  ;;  %419 = vmatpush1.bf16.msra.mxu1 %v2333_v16  ;;  %v2374_v45 = vld [vmem:[#allocation8 + $0x48] ss:$16 sps:$4 sm:$0xff]   ;;  %v2379_v46 = vld [vmem:[#allocation8 + $0x64] ss:$16 sps:$4 sm:$0xff]   ;;  %v2382_v47 = vld [vmem:[#allocation8 + $0x6c] ss:$16 sps:$4 sm:$0xff]  }
  0x6b   :  { %377 = vmatprep.subr.bf16.mxu0 %v2334_v17  ;;  %420 = vmatprep.subr.bf16.mxu1 %v2336_v18  ;;  %v2377_v48 = vld [vmem:[#allocation8 + $0x60] ss:$16 sps:$4 sm:$0xff]   ;;  %v2380_v49 = vld [vmem:[#allocation8 + $0x68] ss:$16 sps:$4 sm:$0xff]   ;;  %v2385_v50 = vld [vmem:[#allocation8 + $0x84] ss:$16 sps:$4 sm:$0xff]  }
  0x6c   :  { %v2388_v51 = vld [vmem:[#allocation8 + $0x8c] ss:$16 sps:$4 sm:$0xff]   ;;  %v2383_v52 = vld [vmem:[#allocation8 + $0x80] ss:$16 sps:$4 sm:$0xff]   ;;  %v2386_v53 = vld [vmem:[#allocation8 + $0x88] ss:$16 sps:$4 sm:$0xff]  }
  0x6d   :  { %v2391_v54 = vld [vmem:[#allocation8 + $0xa4] ss:$16 sps:$4 sm:$0xff]   ;;  %v2394_v55 = vld [vmem:[#allocation8 + $0xac] ss:$16 sps:$4 sm:$0xff]   ;;  %v2389_v56 = vld [vmem:[#allocation8 + $0xa0] ss:$16 sps:$4 sm:$0xff]  }
  0x6e   :  { %378 = vmatpush1.bf16.msra.mxu0 %v2338_v19  ;;  %421 = vmatpush1.bf16.msra.mxu1 %v2339_v20  ;;  %v2392_v57 = vld [vmem:[#allocation8 + $0xa8] ss:$16 sps:$4 sm:$0xff]   ;;  %v2397_v58 = vld [vmem:[#allocation8 + $0xc4] ss:$16 sps:$4 sm:$0xff]   ;;  %v2400_v59 = vld [vmem:[#allocation8 + $0xcc] ss:$16 sps:$4 sm:$0xff]  }
  0x6f   :  { %379 = vmatprep.subr.bf16.mxu0 %v2340_v21  ;;  %422 = vmatprep.subr.bf16.mxu1 %v2342_v22  ;;  %v2395_v60 = vld [vmem:[#allocation8 + $0xc0] ss:$16 sps:$4 sm:$0xff]   ;;  %v2398_v61 = vld [vmem:[#allocation8 + $0xc8] ss:$16 sps:$4 sm:$0xff]   ;;  %v2403_v62 = vld [vmem:[#allocation8 + $0xe4] ss:$16 sps:$4 sm:$0xff]  }
  0x70   :  { %v2406_v63 = vld [vmem:[#allocation8 + $0xec] ss:$16 sps:$4 sm:$0xff]   ;;  %v2401_v0 = vld [vmem:[#allocation8 + $0xe0] ss:$16 sps:$4 sm:$0xff]   ;;  %v2404_v1 = vld [vmem:[#allocation8 + $0xe8] ss:$16 sps:$4 sm:$0xff]  }
  0x71   :  { %v2409_v2 = vld [vmem:[#allocation8 + $0x104] ss:$16 sps:$4 sm:$0xff]   ;;  %v2412_v3 = vld [vmem:[#allocation8 + $0x10c] ss:$16 sps:$4 sm:$0xff]   ;;  %v2407_v4 = vld [vmem:[#allocation8 + $0x100] ss:$16 sps:$4 sm:$0xff]  }
  0x72   :  { %380 = vmatpush1.bf16.msra.mxu0 %v2344_v23  ;;  %423 = vmatpush1.bf16.msra.mxu1 %v2345_v24  ;;  %v2410_v5 = vld [vmem:[#allocation8 + $0x108] ss:$16 sps:$4 sm:$0xff]   ;;  %v2415_v6 = vld [vmem:[#allocation8 + $0x124] ss:$16 sps:$4 sm:$0xff]   ;;  %v2418_v7 = vld [vmem:[#allocation8 + $0x12c] ss:$16 sps:$4 sm:$0xff]  }
  0x73   :  { %381 = vmatprep.subr.bf16.mxu0 %v2346_v25  ;;  %424 = vmatprep.subr.bf16.mxu1 %v2348_v26  ;;  %v2457_v8 = vld [vmem:[#allocation3 + $0x4] ss:$8 sps:$4 sm:$0xff]   ;;  %v2413_v9 = vld [vmem:[#allocation8 + $0x120] ss:$16 sps:$4 sm:$0xff]   ;;  %v2416_v10 = vld [vmem:[#allocation8 + $0x128] ss:$16 sps:$4 sm:$0xff]  }
  0x74   :  { %v2421_v11 = vld [vmem:[#allocation8 + $0x144] ss:$16 sps:$4 sm:$0xff]   ;;  %v2424_v12 = vld [vmem:[#allocation8 + $0x14c] ss:$16 sps:$4 sm:$0xff]   ;;  %v2419_v13 = vld [vmem:[#allocation8 + $0x140] ss:$16 sps:$4 sm:$0xff]  }
  0x75   :  { %v2422_v14 = vld [vmem:[#allocation8 + $0x148] ss:$16 sps:$4 sm:$0xff]   ;;  %v2427_v15 = vld [vmem:[#allocation8 + $0x164] ss:$16 sps:$4 sm:$0xff]   ;;  %v2430_v16 = vld [vmem:[#allocation8 + $0x16c] ss:$16 sps:$4 sm:$0xff]  }
  0x76   :  { %382 = vmatpush1.bf16.msra.mxu0 %v2350_v27  ;;  %425 = vmatpush1.bf16.msra.mxu1 %v2351_v28  ;;  %v2425_v17 = vld [vmem:[#allocation8 + $0x160] ss:$16 sps:$4 sm:$0xff]   ;;  %v2428_v18 = vld [vmem:[#allocation8 + $0x168] ss:$16 sps:$4 sm:$0xff]   ;;  %v2433_v19 = vld [vmem:[#allocation8 + $0x184] ss:$16 sps:$4 sm:$0xff]  }
  0x77   :  { %383 = vmatprep.subr.bf16.mxu0 %v2352_v29  ;;  %426 = vmatprep.subr.bf16.mxu1 %v2354_v30  ;;  %v2436_v20 = vld [vmem:[#allocation8 + $0x18c] ss:$16 sps:$4 sm:$0xff]   ;;  %v2431_v21 = vld [vmem:[#allocation8 + $0x180] ss:$16 sps:$4 sm:$0xff]   ;;  %v2434_v22 = vld [vmem:[#allocation8 + $0x188] ss:$16 sps:$4 sm:$0xff]  }
  0x78   :  { %v2439_v23 = vld [vmem:[#allocation8 + $0x1a4] ss:$16 sps:$4 sm:$0xff]   ;;  %v2442_v24 = vld [vmem:[#allocation8 + $0x1ac] ss:$16 sps:$4 sm:$0xff]   ;;  %v2437_v25 = vld [vmem:[#allocation8 + $0x1a0] ss:$16 sps:$4 sm:$0xff]  }
  0x79   :  { %v2440_v26 = vld [vmem:[#allocation8 + $0x1a8] ss:$16 sps:$4 sm:$0xff]   ;;  %v2445_v27 = vld [vmem:[#allocation8 + $0x1c4] ss:$16 sps:$4 sm:$0xff]   ;;  %v2448_v28 = vld [vmem:[#allocation8 + $0x1cc] ss:$16 sps:$4 sm:$0xff]  }
  0x7a   :  { %384 = vmatpush1.bf16.msra.mxu0 %v2356_v31  ;;  %427 = vmatpush1.bf16.msra.mxu1 %v2357_v32  ;;  %v2443_v29 = vld [vmem:[#allocation8 + $0x1c0] ss:$16 sps:$4 sm:$0xff]   ;;  %v2446_v30 = vld [vmem:[#allocation8 + $0x1c8] ss:$16 sps:$4 sm:$0xff]   ;;  %v2451_v31 = vld [vmem:[#allocation8 + $0x1e4] ss:$16 sps:$4 sm:$0xff]  }
  0x7b   :  { %785 = vmatprep.subr.bf16.mxu0 %v2360_v33  ;;  %828 = vmatprep.subr.bf16.mxu1 %v2363_v34  ;;  %v2454_v32 = vld [vmem:[#allocation8 + $0x1ec] ss:$16 sps:$4 sm:$0xff]   ;;  %v2449_v33 = vld [vmem:[#allocation8 + $0x1e0] ss:$16 sps:$4 sm:$0xff]   ;;  %v2452_v34 = vld [vmem:[#allocation8 + $0x1e8] ss:$16 sps:$4 sm:$0xff]  }
  0x7c   :  { %s2807_s12 = smov [#allocation12]   ;;  %vm2022_vm0 = vcmask 122880  }
  0x7d   :  { %402 = vmatmul.mubr.bf16.vlgmr.msra.gmra.mrb[0].mxu0 %v2364_v36  ;;  %445 = vmatmul.mubr.bf16.vlgmr.msra.gmra.mrb[0].mxu1 %v2364_v36  ;;  %v2463_v36 = vld [vmem:[#allocation11 + $0xc] ss:$16 sps:$4 sm:$0xff]   ;;  %s2030_s13 = sshll.u32 %s2807_s12, 4  ;;  %s2031_s13 = int_to_ptr.vmem [resolvable:$true] %s2030_s13 }
  0x7e   :  { %786 = vmatpush1.bf16.msra.mxu0 %v2358_v35  ;;  %829 = vmatpush1.bf16.msra.mxu1 %v2361_v37  ;;  %v2460_v35 = vld [vmem:[#allocation11 + $0x4] ss:$16 sps:$4 sm:$0xff]   ;;  %v2455_v37 = vld [vmem:[#allocation3] ss:$8 sps:$4 sm:$0xff]   ;;  %s2768_s1 = scalar_lea.vmem %s2031_s13, 32  ;;  %p2769_p13 = scmp.lt.s32.totalorder %s2031_s13, %s2031_s13 }
  0x7f   :  { %787 = vmatprep.subr.bf16.mxu0 %v2367_v38  ;;  %830 = vmatprep.subr.bf16.mxu1 %v2370_v39  ;;  %v2458_v38 = vld [vmem:[#allocation11] ss:$16 sps:$4 sm:$0xff]   ;;  %v2461_v39 = vld [vmem:[#allocation11 + $0x8] ss:$16 sps:$4 sm:$0xff]  }
  0x80   :  { %817 = vmatprep.mubr.bf16.mxu0 %v2457_v8  ;;  %860 = vmatprep.mubr.bf16.mxu1 %v2457_v8  ;;  %v2514_v8 = vld [vmem:[#allocation11 + $0x124] ss:$16 sps:$4 sm:$0xff]  }
  0x82   :  { %788 = vmatpush1.bf16.msra.mxu0 %v2365_v40  ;;  %831 = vmatpush1.bf16.msra.mxu1 %v2368_v41  ;;  %v2466_v40 = vld [vmem:[#allocation11 + $0x24] ss:$16 sps:$4 sm:$0xff]   ;;  %v2469_v41 = vld [vmem:[#allocation11 + $0x2c] ss:$16 sps:$4 sm:$0xff]  }
  0x83   :  { %789 = vmatprep.subr.bf16.mxu0 %v2373_v42  ;;  %832 = vmatprep.subr.bf16.mxu1 %v2376_v43  ;;  %v2464_v42 = vld [vmem:[#allocation11 + $0x20] ss:$16 sps:$4 sm:$0xff]   ;;  %v2467_v43 = vld [vmem:[#allocation11 + $0x28] ss:$16 sps:$4 sm:$0xff]  }
  0x86   :  { %790 = vmatpush1.bf16.msra.mxu0 %v2371_v44  ;;  %833 = vmatpush1.bf16.msra.mxu1 %v2374_v45  ;;  %v2472_v44 = vld [vmem:[#allocation11 + $0x44] ss:$16 sps:$4 sm:$0xff]   ;;  %v2475_v45 = vld [vmem:[#allocation11 + $0x4c] ss:$16 sps:$4 sm:$0xff]  }
  0x87   :  { %791 = vmatprep.subr.bf16.mxu0 %v2379_v46  ;;  %834 = vmatprep.subr.bf16.mxu1 %v2382_v47  ;;  %v2470_v46 = vld [vmem:[#allocation11 + $0x40] ss:$16 sps:$4 sm:$0xff]   ;;  %v2473_v47 = vld [vmem:[#allocation11 + $0x48] ss:$16 sps:$4 sm:$0xff]  }
  0x8a   :  { %792 = vmatpush1.bf16.msra.mxu0 %v2377_v48  ;;  %835 = vmatpush1.bf16.msra.mxu1 %v2380_v49  ;;  %v2478_v48 = vld [vmem:[#allocation11 + $0x64] ss:$16 sps:$4 sm:$0xff]   ;;  %v2481_v49 = vld [vmem:[#allocation11 + $0x6c] ss:$16 sps:$4 sm:$0xff]  }
  0x8b   :  { %793 = vmatprep.subr.bf16.mxu0 %v2385_v50  ;;  %836 = vmatprep.subr.bf16.mxu1 %v2388_v51  ;;  %v2476_v50 = vld [vmem:[#allocation11 + $0x60] ss:$16 sps:$4 sm:$0xff]   ;;  %v2479_v51 = vld [vmem:[#allocation11 + $0x68] ss:$16 sps:$4 sm:$0xff]  }
  0x8e   :  { %794 = vmatpush1.bf16.msra.mxu0 %v2383_v52  ;;  %837 = vmatpush1.bf16.msra.mxu1 %v2386_v53  ;;  %v2484_v52 = vld [vmem:[#allocation11 + $0x84] ss:$16 sps:$4 sm:$0xff]   ;;  %v2487_v53 = vld [vmem:[#allocation11 + $0x8c] ss:$16 sps:$4 sm:$0xff]  }
  0x8f   :  { %795 = vmatprep.subr.bf16.mxu0 %v2391_v54  ;;  %838 = vmatprep.subr.bf16.mxu1 %v2394_v55  ;;  %v2482_v54 = vld [vmem:[#allocation11 + $0x80] ss:$16 sps:$4 sm:$0xff]   ;;  %v2485_v55 = vld [vmem:[#allocation11 + $0x88] ss:$16 sps:$4 sm:$0xff]  }
  0x92   :  { %796 = vmatpush1.bf16.msra.mxu0 %v2389_v56  ;;  %839 = vmatpush1.bf16.msra.mxu1 %v2392_v57  ;;  %v2490_v56 = vld [vmem:[#allocation11 + $0xa4] ss:$16 sps:$4 sm:$0xff]   ;;  %v2493_v57 = vld [vmem:[#allocation11 + $0xac] ss:$16 sps:$4 sm:$0xff]  }
  0x93   :  { %797 = vmatprep.subr.bf16.mxu0 %v2397_v58  ;;  %840 = vmatprep.subr.bf16.mxu1 %v2400_v59  ;;  %v2488_v58 = vld [vmem:[#allocation11 + $0xa0] ss:$16 sps:$4 sm:$0xff]   ;;  %v2491_v59 = vld [vmem:[#allocation11 + $0xa8] ss:$16 sps:$4 sm:$0xff]  }
  0x96   :  { %798 = vmatpush1.bf16.msra.mxu0 %v2395_v60  ;;  %841 = vmatpush1.bf16.msra.mxu1 %v2398_v61  ;;  %v2496_v60 = vld [vmem:[#allocation11 + $0xc4] ss:$16 sps:$4 sm:$0xff]   ;;  %v2499_v61 = vld [vmem:[#allocation11 + $0xcc] ss:$16 sps:$4 sm:$0xff]  }
  0x97   :  { %799 = vmatprep.subr.bf16.mxu0 %v2403_v62  ;;  %842 = vmatprep.subr.bf16.mxu1 %v2406_v63  ;;  %v2494_v62 = vld [vmem:[#allocation11 + $0xc0] ss:$16 sps:$4 sm:$0xff]   ;;  %v2497_v63 = vld [vmem:[#allocation11 + $0xc8] ss:$16 sps:$4 sm:$0xff]  }
  0x9a   :  { %800 = vmatpush1.bf16.msra.mxu0 %v2401_v0  ;;  %843 = vmatpush1.bf16.msra.mxu1 %v2404_v1  ;;  %v2502_v0 = vld [vmem:[#allocation11 + $0xe4] ss:$16 sps:$4 sm:$0xff]   ;;  %v2505_v1 = vld [vmem:[#allocation11 + $0xec] ss:$16 sps:$4 sm:$0xff]  }
  0x9b   :  { %801 = vmatprep.subr.bf16.mxu0 %v2409_v2  ;;  %844 = vmatprep.subr.bf16.mxu1 %v2412_v3  ;;  %v2500_v2 = vld [vmem:[#allocation11 + $0xe0] ss:$16 sps:$4 sm:$0xff]   ;;  %v2503_v3 = vld [vmem:[#allocation11 + $0xe8] ss:$16 sps:$4 sm:$0xff]  }
  0x9e   :  { %802 = vmatpush1.bf16.msra.mxu0 %v2407_v4  ;;  %845 = vmatpush1.bf16.msra.mxu1 %v2410_v5  ;;  %v2508_v4 = vld [vmem:[#allocation11 + $0x104] ss:$16 sps:$4 sm:$0xff]   ;;  %v2511_v5 = vld [vmem:[#allocation11 + $0x10c] ss:$16 sps:$4 sm:$0xff]  }
  0x9f   :  { %803 = vmatprep.subr.bf16.mxu0 %v2415_v6  ;;  %846 = vmatprep.subr.bf16.mxu1 %v2418_v7  ;;  %v2506_v6 = vld [vmem:[#allocation11 + $0x100] ss:$16 sps:$4 sm:$0xff]   ;;  %v2509_v7 = vld [vmem:[#allocation11 + $0x108] ss:$16 sps:$4 sm:$0xff]  }
  0xa2   :  { %804 = vmatpush1.bf16.msra.mxu0 %v2413_v9  ;;  %847 = vmatpush1.bf16.msra.mxu1 %v2416_v10  ;;  %v2517_v9 = vld [vmem:[#allocation11 + $0x12c] ss:$16 sps:$4 sm:$0xff]   ;;  %v2512_v10 = vld [vmem:[#allocation11 + $0x120] ss:$16 sps:$4 sm:$0xff]  }
  0xa3   :  { %805 = vmatprep.subr.bf16.mxu0 %v2421_v11  ;;  %848 = vmatprep.subr.bf16.mxu1 %v2424_v12  ;;  %v2515_v11 = vld [vmem:[#allocation11 + $0x128] ss:$16 sps:$4 sm:$0xff]   ;;  %v2520_v12 = vld [vmem:[#allocation11 + $0x144] ss:$16 sps:$4 sm:$0xff]  }
  0xa6   :  { %806 = vmatpush1.bf16.msra.mxu0 %v2419_v13  ;;  %849 = vmatpush1.bf16.msra.mxu1 %v2422_v14  ;;  %v2523_v13 = vld [vmem:[#allocation11 + $0x14c] ss:$16 sps:$4 sm:$0xff]   ;;  %v2518_v14 = vld [vmem:[#allocation11 + $0x140] ss:$16 sps:$4 sm:$0xff]  }
  0xa7   :  { %807 = vmatprep.subr.bf16.mxu0 %v2427_v15  ;;  %850 = vmatprep.subr.bf16.mxu1 %v2430_v16  ;;  %v2521_v15 = vld [vmem:[#allocation11 + $0x148] ss:$16 sps:$4 sm:$0xff]   ;;  %v2526_v16 = vld [vmem:[#allocation11 + $0x164] ss:$16 sps:$4 sm:$0xff]  }
  0xaa   :  { %808 = vmatpush1.bf16.msra.mxu0 %v2425_v17  ;;  %851 = vmatpush1.bf16.msra.mxu1 %v2428_v18  ;;  %v2529_v17 = vld [vmem:[#allocation11 + $0x16c] ss:$16 sps:$4 sm:$0xff]   ;;  %v2524_v18 = vld [vmem:[#allocation11 + $0x160] ss:$16 sps:$4 sm:$0xff]  }
  0xab   :  { %809 = vmatprep.subr.bf16.mxu0 %v2433_v19  ;;  %852 = vmatprep.subr.bf16.mxu1 %v2436_v20  ;;  %v2527_v19 = vld [vmem:[#allocation11 + $0x168] ss:$16 sps:$4 sm:$0xff]   ;;  %v2532_v20 = vld [vmem:[#allocation11 + $0x184] ss:$16 sps:$4 sm:$0xff]  }
  0xae   :  { %810 = vmatpush1.bf16.msra.mxu0 %v2431_v21  ;;  %853 = vmatpush1.bf16.msra.mxu1 %v2434_v22  ;;  %v2535_v21 = vld [vmem:[#allocation11 + $0x18c] ss:$16 sps:$4 sm:$0xff]   ;;  %v2530_v22 = vld [vmem:[#allocation11 + $0x180] ss:$16 sps:$4 sm:$0xff]  }
  0xaf   :  { %811 = vmatprep.subr.bf16.mxu0 %v2439_v23  ;;  %854 = vmatprep.subr.bf16.mxu1 %v2442_v24  ;;  %v2533_v23 = vld [vmem:[#allocation11 + $0x188] ss:$16 sps:$4 sm:$0xff]   ;;  %v2538_v24 = vld [vmem:[#allocation11 + $0x1a4] ss:$16 sps:$4 sm:$0xff]  }
  0xb2   :  { %812 = vmatpush1.bf16.msra.mxu0 %v2437_v25  ;;  %855 = vmatpush1.bf16.msra.mxu1 %v2440_v26  ;;  %v2541_v25 = vld [vmem:[#allocation11 + $0x1ac] ss:$16 sps:$4 sm:$0xff]   ;;  %v2536_v26 = vld [vmem:[#allocation11 + $0x1a0] ss:$16 sps:$4 sm:$0xff]  }
  0xb3   :  { %813 = vmatprep.subr.bf16.mxu0 %v2445_v27  ;;  %856 = vmatprep.subr.bf16.mxu1 %v2448_v28  ;;  %v2539_v27 = vld [vmem:[#allocation11 + $0x1a8] ss:$16 sps:$4 sm:$0xff]   ;;  %v2544_v28 = vld [vmem:[#allocation11 + $0x1c4] ss:$16 sps:$4 sm:$0xff]  }
  0xb6   :  { %814 = vmatpush1.bf16.msra.mxu0 %v2443_v29  ;;  %857 = vmatpush1.bf16.msra.mxu1 %v2446_v30  ;;  %v2547_v29 = vld [vmem:[#allocation11 + $0x1cc] ss:$16 sps:$4 sm:$0xff]   ;;  %v2542_v30 = vld [vmem:[#allocation11 + $0x1c0] ss:$16 sps:$4 sm:$0xff]  }
  0xb7   :  { %815 = vmatprep.subr.bf16.mxu0 %v2451_v31  ;;  %858 = vmatprep.subr.bf16.mxu1 %v2454_v32  ;;  %v2545_v31 = vld [vmem:[#allocation11 + $0x1c8] ss:$16 sps:$4 sm:$0xff]   ;;  %v2550_v32 = vld [vmem:[#allocation11 + $0x1e4] ss:$16 sps:$4 sm:$0xff]  }
  0xba   :  { %816 = vmatpush1.bf16.msra.mxu0 %v2449_v33  ;;  %859 = vmatpush1.bf16.msra.mxu1 %v2452_v34  ;;  %v2553_v33 = vld [vmem:[#allocation11 + $0x1ec] ss:$16 sps:$4 sm:$0xff]   ;;  %v2548_v34 = vld [vmem:[#allocation11 + $0x1e0] ss:$16 sps:$4 sm:$0xff]  }
  0xbb   :  { %1711 = vmatprep.subr.bf16.mxu0 %v2460_v35  ;;  %1797 = vmatprep.subr.bf16.mxu1 %v2463_v36  ;;  %v2551_v35 = vld [vmem:[#allocation11 + $0x1e8] ss:$16 sps:$4 sm:$0xff]   ;;  %v2556_v36 = vld [vmem:[#allocation11 + $0x204] ss:$16 sps:$4 sm:$0xff]  }
  0xbd   :  { %818 = vmatmul.mubr.bf16.vlgmr.msra.gmra.mrb[0].mxu0 %v2455_v37  ;;  %861 = vmatmul.mubr.bf16.vlgmr.msra.gmra.mrb[0].mxu1 %v2455_v37  ;;  %v2559_v37 = vld [vmem:[#allocation11 + $0x20c] ss:$16 sps:$4 sm:$0xff]  }
  0xbe   :  { %1712 = vmatpush1.bf16.msra.mxu0 %v2458_v38  ;;  %1798 = vmatpush1.bf16.msra.mxu1 %v2461_v39  ;;  %v873_v38 = vlaneseq }
  0xbf   :  { %1713 = vmatprep.subr.bf16.mxu0 %v2466_v40  ;;  %1799 = vmatprep.subr.bf16.mxu1 %v2469_v41 }
  0xc0   :  { %v2927_v39 = vshrl.u32 %v873_v38, 7  ;;  %v2581_v38 = vld [vmem:[#allocation11 + $0x288] ss:$16 sps:$4 sm:$0xff]  }
  0xc2   :  { %1714 = vmatpush1.bf16.msra.mxu0 %v2464_v42  ;;  %1800 = vmatpush1.bf16.msra.mxu1 %v2467_v43  ;;  %v875_v40 = vsub.s32 0, %v2927_v39  ;;  %v883_v41 = vsub.s32 2, %v2927_v39  ;;  %v871_v42 = vld [vmem:[%s2982_s4] sm:$0xf]  ;;  %v879_v43 = vsub.s32 1, %v2927_v39 }
  0xc3   :  { %1715 = vmatprep.subr.bf16.mxu0 %v2472_v44  ;;  %1801 = vmatprep.subr.bf16.mxu1 %v2475_v45  ;;  %v887_v44 = vsub.s32 3, %v2927_v39 }
  0xc4   :  { %v876_v45 = vrot.slane %v871_v42, %v875_v40 }
  0xc6   :  { %1716 = vmatpush1.bf16.msra.mxu0 %v2470_v46  ;;  %1802 = vmatpush1.bf16.msra.mxu1 %v2473_v47  ;;  %v884_v46 = vrot.slane %v871_v42, %v883_v41  ;;  %v880_v47 = vrot.slane %v871_v42, %v879_v43 }
  0xc7   :  { %1717 = vmatprep.subr.bf16.mxu0 %v2478_v48  ;;  %1803 = vmatprep.subr.bf16.mxu1 %v2481_v49  ;;  %v888_v48 = vrot.slane %v871_v42, %v887_v44  ;;  %v2586_v42 = vld [vmem:[#allocation11 + $0x2a4] ss:$16 sps:$4 sm:$0xff]  }
  0xca   :  { %1718 = vmatpush1.bf16.msra.mxu0 %v2476_v50  ;;  %1804 = vmatpush1.bf16.msra.mxu1 %v2479_v51 }
  0xcb   :  { %1719 = vmatprep.subr.bf16.mxu0 %v2484_v52  ;;  %1805 = vmatprep.subr.bf16.mxu1 %v2487_v53 }
  0xce   :  { %1720 = vmatpush1.bf16.msra.mxu0 %v2482_v54  ;;  %1806 = vmatpush1.bf16.msra.mxu1 %v2485_v55 }
  0xcf   :  { %1721 = vmatprep.subr.bf16.mxu0 %v2490_v56  ;;  %1807 = vmatprep.subr.bf16.mxu1 %v2493_v57 }
  0xd2   :  { %1722 = vmatpush1.bf16.msra.mxu0 %v2488_v58  ;;  %1808 = vmatpush1.bf16.msra.mxu1 %v2491_v59 }
  0xd3   :  { %1723 = vmatprep.subr.bf16.mxu0 %v2496_v60  ;;  %1809 = vmatprep.subr.bf16.mxu1 %v2499_v61 }
  0xd6   :  { %1724 = vmatpush1.bf16.msra.mxu0 %v2494_v62  ;;  %1810 = vmatpush1.bf16.msra.mxu1 %v2497_v63 }
  0xd7   :  { %1725 = vmatprep.subr.bf16.mxu0 %v2502_v0  ;;  %1811 = vmatprep.subr.bf16.mxu1 %v2505_v1 }
  0xda   :  { %1726 = vmatpush1.bf16.msra.mxu0 %v2500_v2  ;;  %1812 = vmatpush1.bf16.msra.mxu1 %v2503_v3 }
  0xdb   :  { %1727 = vmatprep.subr.bf16.mxu0 %v2508_v4  ;;  %1813 = vmatprep.subr.bf16.mxu1 %v2511_v5 }
  0xde   :  { %1728 = vmatpush1.bf16.msra.mxu0 %v2506_v6  ;;  %1814 = vmatpush1.bf16.msra.mxu1 %v2509_v7 }
  0xdf   :  { %1729 = vmatprep.subr.bf16.mxu0 %v2514_v8  ;;  %1815 = vmatprep.subr.bf16.mxu1 %v2517_v9 }
  0xe2   :  { %1730 = vmatpush1.bf16.msra.mxu0 %v2512_v10  ;;  %1816 = vmatpush1.bf16.msra.mxu1 %v2515_v11 }
  0xe3   :  { %1731 = vmatprep.subr.bf16.mxu0 %v2520_v12  ;;  %1817 = vmatprep.subr.bf16.mxu1 %v2523_v13 }
  0xe6   :  { %1732 = vmatpush1.bf16.msra.mxu0 %v2518_v14  ;;  %1818 = vmatpush1.bf16.msra.mxu1 %v2521_v15 }
  0xe7   :  { %1733 = vmatprep.subr.bf16.mxu0 %v2526_v16  ;;  %1819 = vmatprep.subr.bf16.mxu1 %v2529_v17 }
  0xea   :  { %1734 = vmatpush1.bf16.msra.mxu0 %v2524_v18  ;;  %1820 = vmatpush1.bf16.msra.mxu1 %v2527_v19 }
  0xeb   :  { %1735 = vmatprep.subr.bf16.mxu0 %v2532_v20  ;;  %1821 = vmatprep.subr.bf16.mxu1 %v2535_v21  ;;  %v2554_v20 = vld [vmem:[#allocation11 + $0x200] ss:$16 sps:$4 sm:$0xff]   ;;  %v2557_v21 = vld [vmem:[#allocation11 + $0x208] ss:$16 sps:$4 sm:$0xff]  }
  0xee   :  { %1736 = vmatpush1.bf16.msra.mxu0 %v2530_v22  ;;  %1822 = vmatpush1.bf16.msra.mxu1 %v2533_v23  ;;  %v2562_v23 = vld [vmem:[#allocation11 + $0x224] ss:$16 sps:$4 sm:$0xff]  }
  0xef   :  { %1737 = vmatprep.subr.bf16.mxu0 %v2538_v24  ;;  %1823 = vmatprep.subr.bf16.mxu1 %v2541_v25  ;;  %v2565_v24 = vld [vmem:[#allocation11 + $0x22c] ss:$16 sps:$4 sm:$0xff]   ;;  %v2560_v25 = vld [vmem:[#allocation11 + $0x220] ss:$16 sps:$4 sm:$0xff]  }
  0xf2   :  { %1738 = vmatpush1.bf16.msra.mxu0 %v2536_v26  ;;  %1824 = vmatpush1.bf16.msra.mxu1 %v2539_v27  ;;  %v2563_v26 = vld [vmem:[#allocation11 + $0x228] ss:$16 sps:$4 sm:$0xff]   ;;  %v2568_v27 = vld [vmem:[#allocation11 + $0x244] ss:$16 sps:$4 sm:$0xff]  }
  0xf3   :  { %1739 = vmatprep.subr.bf16.mxu0 %v2544_v28  ;;  %1825 = vmatprep.subr.bf16.mxu1 %v2547_v29  ;;  %v2571_v28 = vld [vmem:[#allocation11 + $0x24c] ss:$16 sps:$4 sm:$0xff]   ;;  %v2566_v29 = vld [vmem:[#allocation11 + $0x240] ss:$16 sps:$4 sm:$0xff]  }
  0xf6   :  { %1740 = vmatpush1.bf16.msra.mxu0 %v2542_v30  ;;  %1826 = vmatpush1.bf16.msra.mxu1 %v2545_v31  ;;  %v2569_v30 = vld [vmem:[#allocation11 + $0x248] ss:$16 sps:$4 sm:$0xff]   ;;  %v2574_v31 = vld [vmem:[#allocation11 + $0x264] ss:$16 sps:$4 sm:$0xff]  }
  0xf7   :  { %1741 = vmatprep.subr.bf16.mxu0 %v2550_v32  ;;  %1827 = vmatprep.subr.bf16.mxu1 %v2553_v33  ;;  %v2577_v32 = vld [vmem:[#allocation11 + $0x26c] ss:$16 sps:$4 sm:$0xff]   ;;  %v2572_v33 = vld [vmem:[#allocation11 + $0x260] ss:$16 sps:$4 sm:$0xff]  }
  0xfa   :  { %1742 = vmatpush1.bf16.msra.mxu0 %v2548_v34  ;;  %1828 = vmatpush1.bf16.msra.mxu1 %v2551_v35  ;;  %v2575_v34 = vld [vmem:[#allocation11 + $0x268] ss:$16 sps:$4 sm:$0xff]   ;;  %v2580_v35 = vld [vmem:[#allocation11 + $0x284] ss:$16 sps:$4 sm:$0xff]  }
  0xfb   :  { %1754 = vmatprep.subr.bf16.mxu0 %v2556_v36  ;;  %1840 = vmatprep.subr.bf16.mxu1 %v2559_v37  ;;  %v2583_v36 = vld [vmem:[#allocation11 + $0x28c] ss:$16 sps:$4 sm:$0xff]   ;;  %v2578_v37 = vld [vmem:[#allocation11 + $0x280] ss:$16 sps:$4 sm:$0xff]  }
 0x190   :  { %v819_v49 = vpop.f32.mrb[0].mxu0  ;;  %v862_v50 = vpop.f32.mrb[0].mxu1 }
 0x191   :  { %v893_v51 = vadd.f32 %v876_v45, %v819_v49  ;;  %v895_v52 = vadd.f32 %v884_v46, %v862_v50  ;;  %v821_v53 = vpop.f32.mrb[1].mxu0  ;;  %v864_v54 = vpop.f32.mrb[1].mxu1  ;;  %v2595_v49 = vld [vmem:[#allocation11 + $0x2cc] ss:$16 sps:$4 sm:$0xff]   ;;  %v2590_v50 = vld [vmem:[#allocation11 + $0x2c0] ss:$16 sps:$4 sm:$0xff]  }
 0x192   :  { %v894_v55 = vadd.f32 %v880_v47, %v821_v53  ;;  %v896_v56 = vadd.f32 %v888_v48, %v864_v54  ;;  %v823_v57 = vpop.f32.mrb[2].mxu0  ;;  %v866_v58 = vpop.f32.mrb[2].mxu1  ;;  %v2601_v53 = vld [vmem:[#allocation11 + $0x2ec] ss:$16 sps:$4 sm:$0xff]   ;;  %v2596_v54 = vld [vmem:[#allocation11 + $0x2e0] ss:$16 sps:$4 sm:$0xff]  }
 0x193   :  { %v901_v59 = vmul.f32 0.2, %v893_v51  ;;  %v903_v60 = vmul.f32 0.2, %v895_v52  ;;  %v897_v61 = vadd.f32 %v876_v45, %v823_v57  ;;  %v899_v62 = vadd.f32 %v884_v46, %v866_v58  ;;  %v825_v63 = vpop.f32.mrb[3].mxu0  ;;  %v868_v0 = vpop.f32.mrb[3].mxu1 }
 0x194   :  { %v902_v1 = vmul.f32 0.2, %v894_v55  ;;  %v904_v2 = vmul.f32 0.2, %v896_v56  ;;  %v898_v3 = vadd.f32 %v880_v47, %v825_v63  ;;  %v900_v4 = vadd.f32 %v888_v48, %v868_v0  ;;  %v2589_v45 = vld [vmem:[#allocation11 + $0x2ac] ss:$16 sps:$4 sm:$0xff]  }
 0x195   :  { %v905_v5 = vmul.f32 0.2, %v897_v61  ;;  %v907_v6 = vmul.f32 0.2, %v899_v62  ;;  %v909_v9 = vmax.f32 %v893_v51, %v901_v59  ;;  %v911_v10 = vmax.f32 %v895_v52, %v903_v60  ;;  %v2584_v46 = vld [vmem:[#allocation11 + $0x2a0] ss:$16 sps:$4 sm:$0xff]  }
 0x196   :  { %v906_v7 = vmul.f32 0.2, %v898_v3  ;;  %v908_v8 = vmul.f32 0.2, %v900_v4  ;;  %v910_v13 = vmax.f32 %v894_v55, %v902_v1  ;;  %v912_v14 = vmax.f32 %v896_v56, %v904_v2  ;;  %v2587_v47 = vld [vmem:[#allocation11 + $0x2a8] ss:$16 sps:$4 sm:$0xff]  }
 0x197   :  { %v913_v11 = vmax.f32 %v897_v61, %v905_v5  ;;  %v915_v12 = vmax.f32 %v899_v62, %v907_v6  ;;  %v2592_v48 = vld [vmem:[#allocation11 + $0x2c4] ss:$16 sps:$4 sm:$0xff]   ;;  %v2593_v51 = vld [vmem:[#allocation11 + $0x2c8] ss:$16 sps:$4 sm:$0xff]   ;;  %v2607_v57 = vld [vmem:[#allocation11 + $0x30c] ss:$16 sps:$4 sm:$0xff]  }
 0x198   :  { %v914_v15 = vmax.f32 %v898_v3, %v906_v7  ;;  %v916_v16 = vmax.f32 %v900_v4, %v908_v8  ;;  %v2598_v52 = vld [vmem:[#allocation11 + $0x2e4] ss:$16 sps:$4 sm:$0xff]   ;;  %v2599_v55 = vld [vmem:[#allocation11 + $0x2e8] ss:$16 sps:$4 sm:$0xff]   ;;  %v2602_v58 = vld [vmem:[#allocation11 + $0x300] ss:$16 sps:$4 sm:$0xff]  }
 0x199   :  { %v917_v17 = vpack.c.bf16 %v913_v11, %v909_v9  ;;  %v2944_v18 = vpack.c.bf16 %v915_v12, %v911_v10  ;;  %v2604_v56 = vld [vmem:[#allocation11 + $0x304] ss:$16 sps:$4 sm:$0xff]   ;;  %v2605_v59 = vld [vmem:[#allocation11 + $0x308] ss:$16 sps:$4 sm:$0xff]   ;;  %v2613_v61 = vld [vmem:[#allocation11 + $0x32c] ss:$16 sps:$4 sm:$0xff]  }
 0x19a   :  { %v918_v19 = vpack.c.bf16 %v914_v15, %v910_v13  ;;  %v920_v22 = vpack.c.bf16 %v916_v16, %v912_v14  ;;  %v2610_v60 = vld [vmem:[#allocation11 + $0x324] ss:$16 sps:$4 sm:$0xff]   ;;  %v2608_v62 = vld [vmem:[#allocation11 + $0x320] ss:$16 sps:$4 sm:$0xff]   ;;  %v2611_v63 = vld [vmem:[#allocation11 + $0x328] ss:$16 sps:$4 sm:$0xff]  }
 0x19b   :  { %v2616_v0 = vld [vmem:[#allocation11 + $0x344] ss:$16 sps:$4 sm:$0xff]   ;;  %v2619_v1 = vld [vmem:[#allocation11 + $0x34c] ss:$16 sps:$4 sm:$0xff]   ;;  %v2614_v2 = vld [vmem:[#allocation11 + $0x340] ss:$16 sps:$4 sm:$0xff]  }
 0x19c   :  { %1743 = vmatprep.mubr.bf16.mxu0 %v918_v19  ;;  %1829 = vmatprep.mubr.bf16.mxu1 %v918_v19  ;;  %v2617_v3 = vld [vmem:[#allocation11 + $0x348] ss:$16 sps:$4 sm:$0xff]   ;;  %v2622_v4 = vld [vmem:[#allocation11 + $0x364] ss:$16 sps:$4 sm:$0xff]   ;;  %v2625_v5 = vld [vmem:[#allocation11 + $0x36c] ss:$16 sps:$4 sm:$0xff]  }
 0x19d   :  { %1744 = vmatmul.mubr.bf16.vlgmr.msra.gmra.mrb[4].mxu0 %v917_v17  ;;  %1830 = vmatmul.mubr.bf16.vlgmr.msra.gmra.mrb[4].mxu1 %v917_v17  ;;  %v2620_v6 = vld [vmem:[#allocation11 + $0x360] ss:$16 sps:$4 sm:$0xff]   ;;  %v2623_v7 = vld [vmem:[#allocation11 + $0x368] ss:$16 sps:$4 sm:$0xff]   ;;  %v2628_v8 = vld [vmem:[#allocation11 + $0x384] ss:$16 sps:$4 sm:$0xff]  }
 0x19e   :  { %1755 = vmatpush1.bf16.msra.mxu0 %v2554_v20  ;;  %1841 = vmatpush1.bf16.msra.mxu1 %v2557_v21  ;;  %v2631_v9 = vld [vmem:[#allocation11 + $0x38c] ss:$16 sps:$4 sm:$0xff]   ;;  %v2626_v10 = vld [vmem:[#allocation11 + $0x380] ss:$16 sps:$4 sm:$0xff]   ;;  %v2629_v11 = vld [vmem:[#allocation11 + $0x388] ss:$16 sps:$4 sm:$0xff]  }
 0x19f   :  { %1786 = vmatprep.mubr.bf16.mxu0 %v920_v22  ;;  %1872 = vmatprep.mubr.bf16.mxu1 %v920_v22  ;;  %v2634_v12 = vld [vmem:[#allocation11 + $0x3a4] ss:$16 sps:$4 sm:$0xff]   ;;  %v2637_v13 = vld [vmem:[#allocation11 + $0x3ac] ss:$16 sps:$4 sm:$0xff]   ;;  %v2632_v14 = vld [vmem:[#allocation11 + $0x3a0] ss:$16 sps:$4 sm:$0xff]  }
 0x1a0   :  { %1756 = vmatprep.subr.bf16.mxu0 %v2562_v23  ;;  %1842 = vmatprep.subr.bf16.mxu1 %v2565_v24  ;;  %v2635_v15 = vld [vmem:[#allocation11 + $0x3a8] ss:$16 sps:$4 sm:$0xff]   ;;  %v2640_v16 = vld [vmem:[#allocation11 + $0x3c4] ss:$16 sps:$4 sm:$0xff]   ;;  %v2643_v17 = vld [vmem:[#allocation11 + $0x3cc] ss:$16 sps:$4 sm:$0xff]  }
 0x1a1   :  { %v2638_v19 = vld [vmem:[#allocation11 + $0x3c0] ss:$16 sps:$4 sm:$0xff]   ;;  %v2641_v20 = vld [vmem:[#allocation11 + $0x3c8] ss:$16 sps:$4 sm:$0xff]   ;;  %v2646_v21 = vld [vmem:[#allocation11 + $0x3e4] ss:$16 sps:$4 sm:$0xff]  }
 0x1a2   :  { %1757 = vmatpush1.bf16.msra.mxu0 %v2560_v25  ;;  %1843 = vmatpush1.bf16.msra.mxu1 %v2563_v26  ;;  %v2649_v22 = vld [vmem:[#allocation11 + $0x3ec] ss:$16 sps:$4 sm:$0xff]   ;;  %v2644_v23 = vld [vmem:[#allocation11 + $0x3e0] ss:$16 sps:$4 sm:$0xff]   ;;  %v2647_v24 = vld [vmem:[#allocation11 + $0x3e8] ss:$16 sps:$4 sm:$0xff]  }
 0x1a3   :  { %1758 = vmatprep.subr.bf16.mxu0 %v2568_v27  ;;  %1844 = vmatprep.subr.bf16.mxu1 %v2571_v28  ;;  %v2806_v25 = vmov 1966171168   ;;  %v2268_v28 = vld.sshfl [vmem:[%s2985_s7] sm:$0x33 pattern:$0x75316420] }
 0x1a4   :  { %v1916_v26 = vunpack.c.l.s4 %v2806_v25 }
 0x1a6   :  { %1759 = vmatpush1.bf16.msra.mxu0 %v2566_v29  ;;  %1845 = vmatpush1.bf16.msra.mxu1 %v2569_v30  ;;  %v1917_v27 = vunpack.c.0.s8 %v1916_v26  ;;  %v1914_v29 = vcombine.high %v2268_v28, %v2268_v28 }
 0x1a7   :  { %1760 = vmatprep.subr.bf16.mxu0 %v2574_v31  ;;  %1846 = vmatprep.subr.bf16.mxu1 %v2577_v32 }
 0x1a8   :  { %v1920_v30 = vsub.s32 %v1917_v27, %v2927_v39 }
 0x1aa   :  { %1761 = vmatpush1.bf16.msra.mxu0 %v2572_v33  ;;  %1847 = vmatpush1.bf16.msra.mxu1 %v2575_v34  ;;  %v1928_v31 = vrot.slane %v1914_v29, %v1920_v30  ;;  %v1921_v32 = vrot.slane %v2268_v28, %v1920_v30  ;;  %v1049_v34 = vld [vmem:[%s2984_s6] sm:$0xf] }
 0x1ab   :  { %1762 = vmatprep.subr.bf16.mxu0 %v2580_v35  ;;  %1848 = vmatprep.subr.bf16.mxu1 %v2583_v36  ;;  %v1062_v35 = vrot.slane %v1049_v34, %v883_v41  ;;  %v1058_v36 = vrot.slane %v1049_v34, %v879_v43 }
 0x1ac   :  { %v1930_v33 = vcombine.high %v1928_v31, %v1928_v31 }
 0x1ae   :  { %1763 = vmatpush1.bf16.msra.mxu0 %v2578_v37  ;;  %1849 = vmatpush1.bf16.msra.mxu1 %v2581_v38  ;;  %v1066_v37 = vrot.slane %v1049_v34, %v887_v44 }
 0x1af   :  { %1764 = vmatprep.subr.bf16.mxu0 %v2586_v42  ;;  %1850 = vmatprep.subr.bf16.mxu1 %v2589_v45 }
 0x1b2   :  { %1765 = vmatpush1.bf16.msra.mxu0 %v2584_v46  ;;  %1851 = vmatpush1.bf16.msra.mxu1 %v2587_v47 }
 0x1b3   :  { %1766 = vmatprep.subr.bf16.mxu0 %v2592_v48  ;;  %1852 = vmatprep.subr.bf16.mxu1 %v2595_v49 }
 0x1b6   :  { %1767 = vmatpush1.bf16.msra.mxu0 %v2590_v50  ;;  %1853 = vmatpush1.bf16.msra.mxu1 %v2593_v51 }
 0x1b7   :  { %1768 = vmatprep.subr.bf16.mxu0 %v2598_v52  ;;  %1854 = vmatprep.subr.bf16.mxu1 %v2601_v53 }
 0x1ba   :  { %1769 = vmatpush1.bf16.msra.mxu0 %v2596_v54  ;;  %1855 = vmatpush1.bf16.msra.mxu1 %v2599_v55 }
 0x1bb   :  { %1770 = vmatprep.subr.bf16.mxu0 %v2604_v56  ;;  %1856 = vmatprep.subr.bf16.mxu1 %v2607_v57 }
 0x1be   :  { %1771 = vmatpush1.bf16.msra.mxu0 %v2602_v58  ;;  %1857 = vmatpush1.bf16.msra.mxu1 %v2605_v59 }
 0x1bf   :  { %1772 = vmatprep.subr.bf16.mxu0 %v2610_v60  ;;  %1858 = vmatprep.subr.bf16.mxu1 %v2613_v61 }
 0x1c2   :  { %1773 = vmatpush1.bf16.msra.mxu0 %v2608_v62  ;;  %1859 = vmatpush1.bf16.msra.mxu1 %v2611_v63 }
 0x1c3   :  { %1774 = vmatprep.subr.bf16.mxu0 %v2616_v0  ;;  %1860 = vmatprep.subr.bf16.mxu1 %v2619_v1 }
 0x1c6   :  { %1775 = vmatpush1.bf16.msra.mxu0 %v2614_v2  ;;  %1861 = vmatpush1.bf16.msra.mxu1 %v2617_v3 }
 0x1c7   :  { %1776 = vmatprep.subr.bf16.mxu0 %v2622_v4  ;;  %1862 = vmatprep.subr.bf16.mxu1 %v2625_v5 }
 0x1ca   :  { %1777 = vmatpush1.bf16.msra.mxu0 %v2620_v6  ;;  %1863 = vmatpush1.bf16.msra.mxu1 %v2623_v7 }
 0x1cb   :  { %1778 = vmatprep.subr.bf16.mxu0 %v2628_v8  ;;  %1864 = vmatprep.subr.bf16.mxu1 %v2631_v9 }
 0x1ce   :  { %1779 = vmatpush1.bf16.msra.mxu0 %v2626_v10  ;;  %1865 = vmatpush1.bf16.msra.mxu1 %v2629_v11  ;;  %v1929_v10 = vcombine.high %v1921_v32, %v1921_v32  ;;  %v1905_v11 = vstv %s2986_s8  ;;  %s2764_s8 = scalar_lea.vmem %s2031_s13, 16 }
 0x1cf   :  { %1780 = vmatprep.subr.bf16.mxu0 %v2634_v12  ;;  %1866 = vmatprep.subr.bf16.mxu1 %v2637_v13  ;;  %p2765_p12 = scmp.ne.s32.totalorder %s2031_s13, %s2764_s8  ;;  %p2770_p0 = scmp.lt.s32.totalorder %s2768_s1, %s2764_s8 }
 0x1d1   :  { %p2771_p1 = por %p2770_p0, %p2769_p13 }
 0x1d2   :  { %1781 = vmatpush1.bf16.msra.mxu0 %v2632_v14  ;;  %1867 = vmatpush1.bf16.msra.mxu1 %v2635_v15 }
 0x1d3   :  { %1782 = vmatprep.subr.bf16.mxu0 %v2640_v16  ;;  %1868 = vmatprep.subr.bf16.mxu1 %v2643_v17  ;;  %p2772_p2 = pnand %p2771_p1, %p2765_p12 }
 0x1d6   :  { %1783 = vmatpush1.bf16.msra.mxu0 %v2638_v19  ;;  %1869 = vmatpush1.bf16.msra.mxu1 %v2641_v20 }
 0x1d7   :  { %1784 = vmatprep.subr.bf16.mxu0 %v2646_v21  ;;  %1870 = vmatprep.subr.bf16.mxu1 %v2649_v22 }
 0x1da   :  { %1785 = vmatpush1.bf16.msra.mxu0 %v2644_v23  ;;  %1871 = vmatpush1.bf16.msra.mxu1 %v2647_v24 }
 0x1dd   :  { %1787 = vmatmul.mubr.bf16.vlgmr.msra.gmra.mrb[4].mxu0 %v2944_v18  ;;  %1873 = vmatmul.mubr.bf16.vlgmr.msra.gmra.mrb[4].mxu1 %v2944_v18  ;;  %v1054_v18 = vrot.slane %v1049_v34, %v875_v40 }
 0x1de   :  { %1967 = vmatprep.mubr.bf16.mxu1 %v1928_v31  ;;  %2007 = vmatprep.mubr.bf16.mxu0 %v1930_v33 }
 0x2b0   :  { %v1788_v38 = vpop.f32.mrb[4].mxu0  ;;  %v1874_v42 = vpop.f32.mrb[4].mxu1 }
 0x2b1   :  { %v2270_v45 = vadd.f32 %v1788_v38, %v1054_v18  ;;  %v2274_v46 = vadd.f32 %v1874_v42, %v1062_v35  ;;  %v1790_v47 = vpop.f32.mrb[5].mxu0  ;;  %v1876_v48 = vpop.f32.mrb[5].mxu1 }
 0x2b2   :  { %v2271_v49 = vadd.f32 %v1790_v47, %v1058_v36  ;;  %v2275_v50 = vadd.f32 %v1876_v48, %v1066_v37  ;;  %v1792_v51 = vpop.f32.mrb[6].mxu0  ;;  %v1878_v52 = vpop.f32.mrb[6].mxu1 }
 0x2b3   :  { %v1883_v40 = vmul.f32 0.2, %v2270_v45  ;;  %v1885_v53 = vmul.f32 0.2, %v2274_v46  ;;  %v2272_v54 = vadd.f32 %v1792_v51, %v1054_v18  ;;  %v2276_v41 = vadd.f32 %v1878_v52, %v1062_v35  ;;  %v1794_v55 = vpop.f32.mrb[7].mxu0  ;;  %v1880_v56 = vpop.f32.mrb[7].mxu1 }
 0x2b4   :  { %v1884_v43 = vmul.f32 0.2, %v2271_v49  ;;  %v1886_v57 = vmul.f32 0.2, %v2275_v50  ;;  %v2273_v39 = vadd.f32 %v1794_v55, %v1058_v36  ;;  %v2277_v44 = vadd.f32 %v1880_v56, %v1066_v37 }
 0x2b5   :  { %v1887_v58 = vmul.f32 0.2, %v2272_v54  ;;  %v1889_v59 = vmul.f32 0.2, %v2276_v41  ;;  %v1891_v62 = vmax.f32 %v2270_v45, %v1883_v40  ;;  %v1893_v63 = vmax.f32 %v2274_v46, %v1885_v53 }
 0x2b6   :  { %v1888_v60 = vmul.f32 0.2, %v2273_v39  ;;  %v1890_v61 = vmul.f32 0.2, %v2277_v44  ;;  %v1892_v2 = vmax.f32 %v2271_v49, %v1884_v43  ;;  %v1894_v3 = vmax.f32 %v2275_v50, %v1886_v57 }
 0x2b7   :  { %v1895_v0 = vmax.f32 %v2272_v54, %v1887_v58  ;;  %v1897_v1 = vmax.f32 %v2276_v41, %v1889_v59 }
 0x2b8   :  { %v1896_v4 = vmax.f32 %v2273_v39, %v1888_v60  ;;  %v1898_v5 = vmax.f32 %v2277_v44, %v1890_v61 }
 0x2b9   :  { %v1900_v6 = vpack.c.bf16 %v1895_v0, %v1891_v62  ;;  %v1902_v7 = vpack.c.bf16 %v1897_v1, %v1893_v63 }
 0x2ba   :  { %v1901_v8 = vpack.c.bf16 %v1896_v4, %v1892_v2  ;;  %v1903_v9 = vpack.c.bf16 %v1898_v5, %v1894_v3 }
 0x2bc   :  { %1935 = vmatprep.subr.bf16.mxu1 %v1901_v8  ;;  %1975 = vmatprep.subr.bf16.mxu0 %v1903_v9 }
 0x2bd   :  { %1936 = vmatpush1.bf16.xpose.msra.mxu1 %v1900_v6  ;;  %1976 = vmatpush1.bf16.xpose.msra.mxu0 %v1902_v7 }
 0x2c4   :  { %1968 = vmatmul.mubr.bf16.vlgmr.msra.gmra.mrb[8].mxu1 %v1921_v32  ;;  %2008 = vmatmul.mubr.bf16.vlgmr.msra.gmra.mrb[8].mxu0 %v1929_v10 }
 0x397   :  { %v1969_v12 = vpop.f32.mrb[8].mxu1  ;;  %v2009_v13 = vpop.f32.mrb[8].mxu0 }
 0x398   :  { %v1970_v14 = vadd.f32 %v1969_v12, %v1905_v11  ;;  %v1971_v15 = vpop.f32.mrb[9].mxu1  ;;  %v2011_v16 = vpop.f32.mrb[9].mxu0 }
 0x399   :  { %v1972_v17 = vpop.f32.mrb[10].mxu1  ;;  %v2012_v19 = vpop.f32.mrb[10].mxu0 }
 0x39a   :  { %v2010_v20 = vadd.f32 %v2009_v13, %v1970_v14  ;;  %v1973_v21 = vpop.f32.mrb[11].mxu1  ;;  %v2013_v22 = vpop.f32.mrb[11].mxu0 }
 0x39c   :  { %v2269_v23 = vclamps-f32 %v2010_v20, 30.0 }
 0x39e   :  { %v2017_v24 = vsub.f32 0.0, %v2269_v23 }
 0x3a0   :  { %v2018_v25 = vmul.f32 1.442695, %v2017_v24 }
 0x3a2   :  { %2650 = vpow2.f32 %v2018_v25 }
 0x3ac   :  { %v2651_v26 = vpop.eup %2650 }
 0x3ad   :  { %v2020_v27 = vadd.f32 1.0, %v2651_v26 }
 0x3af   :  { %2652 = vrcp.f32 %v2020_v27 }
 0x3b9   :  { %v2653_v28 = vpop.eup %2652 }
 0x3ba   :  { %2023 = vst.msk [vmem:[#allocation12] sm:$0x1] %vm2022_vm0, %v2653_v28 }
 0x3bb   :  { %2775 = shalt.err (!%p2772_p2)
}
 0x3bc   :  { %s2776_s17 = scalar_lea.hbm %s2987_s9, 16 }
 0x3bd   :  { %p2777_p3 = scmp.ne.s32.totalorder %s2987_s9, %s2776_s17  ;;  %p2780_p4 = scmp.lt.u32.totalorder %s2776_s17, %s2987_s9 }
 0x3bf   :  { %p2782_p5 = pnand %p2780_p4, %p2777_p3 }
 0x3c1   :  { %2785 = shalt.err (!%p2782_p5)
}
 0x3c2   :  { %2033 = dma.vmem_to_hbm [thread:$0]  %s2031_s13, 16, %s2987_s9, [#allocation5]  }
 0x3c3   :  { %2792 = dma.done.wait [#allocation5], 16  }
 0x3c4   :  { %2793 = vsyncadd [#allocation5], 4294967280 }
 0x3c5   :  { %2037 = vsyncpa [#allocation4], 1 }
 0x3c6   :  { %2038 = vsyncpa [#allocation7], 1 }
 0x3c7   :  { %2039 = vsyncpa [#allocation10], 1 }
 0x3c8   :  { %2040 = vsyncpa [#allocation5], 1 }

</bundles_post_ra>
